<compile_context>
chip_gen: v5e
topology: v5e:2x2
jax: 0.10.0
libtpu: 0.0.40
codegen_flags: <defaults>
</compile_context>

<pallas_src>
import functools
import math

import jax
import jax.numpy as jnp
from jax import lax
from jax.experimental import pallas as pl
from jax.experimental.pallas import tpu as pltpu


# -----------------------------------------------------------------------------
# Pallas kernel
# -----------------------------------------------------------------------------
def conv_gpool_kernel(msum_ref,       # SMEM (N,) f32 — scalar-prefetched mask_sum_hw
                      x_ref,          # (B, C_in, NPAD)      bf16  padded-width, flattened
                      mask_ref,       # (B, 1, L)            f32   mask in padded-width space
                      wtap_ref,       # (9, C_out+C_g, C_in) bf16  per-tap [Wr | Wg]^T
                      gamma_ref,      # (C_g, 1)             f32
                      beta_ref,       # (C_g, 1)             f32
                      wlin_ref,       # (C_out, 3*C_g)       f32   linear_g^T
                      out_ref,        # (B, C_out, L)        f32   channel-major output
                      *, wp, c_out):
    B = x_ref.shape[0]
    L = out_ref.shape[2]
    base = pl.program_id(0) * B

    gamma = gamma_ref[...]                       # (C_g, 1)
    beta = beta_ref[...]

    for b in range(B):                           # B is small & static -> unrolled
        xb = x_ref[b]                            # (C_in, NPAD) bf16, a few vregs
        mb = mask_ref[b]                         # (1, L) f32

        # 3x3 conv, both branches fused: 9 accumulating MXU matmuls.  Each tap
        # is a contiguous lane slice of the flattened padded plane, and the
        # result lands channel-major -> no transpose, no im2col concat.
        acc = None
        for dy in range(3):
            for dx in range(3):
                k = dy * 3 + dx
                off = dy * wp + dx
                tap = xb[:, off:off + L]                              # (C_in, L)
                part = jnp.dot(wtap_ref[k], tap,
                               preferred_element_type=jnp.float32)    # (C_out+C_g, L)
                acc = part if acc is None else acc + part
        # NOTE: for real trunk widths (C >= 256) the f32 accumulator should be
        # moved to a VMEM scratch; at these sizes (~14 vregs) registers win.

        acc_r = acc[:c_out, :]                   # (C_out, L) free sublane split (c_out % 8 == 0)
        acc_g = acc[c_out:, :]                   # (C_g,  L)

        # NormMask (gamma/beta, no scale) * mask + ReLU — VPU, all f32.
        g = jnp.maximum((acc_g * gamma + beta) * mb, 0.0)

        # KataGPool.  Junk columns (padded width) carry mask == 0: they add 0
        # to the sum and exactly -1 to the max-trick (never the winner), so
        # both reductions equal the dense ones.  Like the PyTorch module, the
        # max-trick is only meaningful when mask_sum_hw > 0 per batch element.
        gsum = jnp.sum(g, axis=1, keepdims=True)                      # (C_g, 1)
        gmax = jnp.max(g + (mb - 1.0), axis=1, keepdims=True)         # (C_g, 1)

        msum = jnp.full((1, 1), msum_ref[base + b], jnp.float32)      # SMEM -> vector
        mean = gsum / msum
        mean2 = mean * ((jnp.sqrt(msum) - 14.0) * 0.1)
        pooled = jnp.concatenate([mean, mean2, gmax], axis=0)         # (3*C_g, 1)

        # linear_g: one tiny f32 matmul per batch element (no extra bf16 rounding).
        lin = jnp.dot(wlin_ref[...], pooled,
                      preferred_element_type=jnp.float32)             # (C_out, 1)

        out_ref[b] = acc_r + lin                 # lane-dense channel-major store


# -----------------------------------------------------------------------------
# Wrapper
# -----------------------------------------------------------------------------
def _pick_block_batch(n):
    # Small fixed block: bounded per-step VMEM footprint, grid length >= 8 when
    # possible.  Only clean divisors are considered (no silent decrement loop).
    for b in (4, 2):
        if n % b == 0 and n // b >= 8:
            return b
    return 1


def conv_and_gpool(x_nchw, mask_n1hw, mask_sum_hw, params, block_batch=None):
    """x: (N, C_in, H, W), mask: (N, 1, H, W), mask_sum_hw: (N, 1, 1, 1).

    Returns (N, C_out, H, W).  Assumes a {0,1} mask with >= 1 unmasked
    position per batch element (same precondition as the PyTorch module).
    """
    wr, wg, gamma, beta, wlin = (params["wr"], params["wg"],
                                 params["gamma"], params["beta"], params["wlin"])
    N, C_in, H, W = x_nchw.shape
    C_out = wr.shape[3]
    C_g = wg.shape[3]

    B = _pick_block_batch(N) if block_batch is None else block_batch
    assert N % B == 0, (N, B)

    # Padded-width flattened layout: 1-px zero border for the 3x3 'SAME' conv,
    # flatten (Hp, Wp), append (Wp - W) columns so every tap slice
    # [dy*Wp+dx : dy*Wp+dx + L] stays in range.
    Hp, Wp = H + 2, W + 2
    L = H * Wp                         # compute-space columns per batch element
    NPAD = Hp * Wp + (Wp - W)          # = max tap offset (2*Wp+2) + L

    x = x_nchw.astype(jnp.bfloat16)
    x = jnp.pad(x, ((0, 0), (0, 0), (1, 1), (1, 1))).reshape(N, C_in, Hp * Wp)
    x = jnp.pad(x, ((0, 0), (0, 0), (0, NPAD - Hp * Wp)))            # (N, C_in, NPAD)

    # Mask in the same padded-width space (junk columns -> 0), lane-dense.
    mask_pw = jnp.pad(mask_n1hw.astype(jnp.float32),
                      ((0, 0), (0, 0), (0, 0), (0, Wp - W)))
    mask_pw = mask_pw.reshape(N, 1, L)

    msum = mask_sum_hw.reshape(N).astype(jnp.float32)

    # Per-tap fused conv weights [Wr | Wg], transposed to (C_out+C_g, C_in).
    wcat = jnp.concatenate([wr, wg], axis=3)                          # (3,3,C_in,C_out+C_g)
    wtap = jnp.transpose(wcat.reshape(9, C_in, C_out + C_g),
                         (0, 2, 1)).astype(jnp.bfloat16)              # (9, C_out+C_g, C_in)

    gamma_c = gamma.reshape(C_g, 1).astype(jnp.float32)
    beta_c = beta.reshape(C_g, 1).astype(jnp.float32)
    wlin_t = jnp.transpose(wlin).astype(jnp.float32)                  # (C_out, 3*C_g)

    kernel = functools.partial(conv_gpool_kernel, wp=Wp, c_out=C_out)

    grid_spec = pltpu.PrefetchScalarGridSpec(
        num_scalar_prefetch=1,                   # msum -> SMEM
        grid=(N // B,),
        in_specs=[
            pl.BlockSpec((B, C_in, NPAD), lambda i, ms: (i, 0, 0)),
            pl.BlockSpec((B, 1, L), lambda i, ms: (i, 0, 0)),
            pl.BlockSpec((9, C_out + C_g, C_in), lambda i, ms: (0, 0, 0)),
            pl.BlockSpec((C_g, 1), lambda i, ms: (0, 0)),
            pl.BlockSpec((C_g, 1), lambda i, ms: (0, 0)),
            pl.BlockSpec((C_out, 3 * C_g), lambda i, ms: (0, 0)),
        ],
        out_specs=pl.BlockSpec((B, C_out, L), lambda i, ms: (i, 0, 0)),
    )

    out = pl.pallas_call(
        kernel,
        out_shape=jax.ShapeDtypeStruct((N, C_out, L), jnp.float32),
        grid_spec=grid_spec,
        compiler_params=pltpu.CompilerParams(
            dimension_semantics=("parallel",),
            # Per-step footprint is <1 MiB incl. double-buffering; 32 MiB is
            # safe headroom on every generation (v5e 16 MiB scoped default,
            # v7x 64 MiB physical per TensorCore).
            vmem_limit_bytes=32 * 1024 * 1024),
    )(msum, x, mask_pw, wtap, gamma_c, beta_c, wlin_t)

    # (N, C_out, L) -> (N, C_out, H, Wp) is a free contiguous reshape; dropping
    # the (Wp - W) junk columns per row is a cheap XLA slice.
    return out.reshape(N, C_out, H, Wp)[:, :, :, :W]


# -----------------------------------------------------------------------------
# Deterministic parameter init (mirrors init_weights: trunc normal, fan_in-based)
# -----------------------------------------------------------------------------
def _trunc_normal(key, shape, fan_in, scale):
    gain = math.sqrt(2.0)
    target_std = scale * gain / math.sqrt(fan_in)
    std = target_std / 0.8796256610342398
    return std * jax.random.truncated_normal(key, -2.0, 2.0, shape, jnp.float32)


def make_params(key, c_in, c_out, c_gpool, scale=1.0):
    k1, k2, k3 = jax.random.split(key, 3)
    r_scale, g_scale = 0.8, 0.6
    # conv weights stored HWIO
    wr = _trunc_normal(k1, (3, 3, c_in, c_out), fan_in=c_in * 9,
                       scale=scale * r_scale)
    wg = _trunc_normal(k2, (3, 3, c_in, c_gpool), fan_in=c_in * 9,
                       scale=math.sqrt(scale) * math.sqrt(g_scale))
    wlin = _trunc_normal(k3, (3 * c_gpool, c_out), fan_in=3 * c_gpool,
                         scale=math.sqrt(scale) * math.sqrt(g_scale))
    gamma = jnp.ones((1, c_gpool), jnp.float32)
    beta = jnp.zeros((1, c_gpool), jnp.float32)
    return {"wr": wr, "wg": wg, "gamma": gamma, "beta": beta, "wlin": wlin}


# -----------------------------------------------------------------------------
# Pure-JAX f32 reference (correctness check)
# -----------------------------------------------------------------------------
def reference(x, mask, mask_sum_hw, params):
    wr, wg, gamma, beta, wlin = (params["wr"], params["wg"],
                                 params["gamma"], params["beta"], params["wlin"])
    N = x.shape[0]
    C_g = wg.shape[3]
    dn = ("NCHW", "HWIO", "NCHW")
    outr = lax.conv_general_dilated(x, wr, (1, 1), "SAME", dimension_numbers=dn)
    outg = lax.conv_general_dilated(x, wg, (1, 1), "SAME", dimension_numbers=dn)
    outg = (outg * gamma.reshape(1, C_g, 1, 1) + beta.reshape(1, C_g, 1, 1)) * mask
    outg = jnp.maximum(outg, 0.0)
    msum = mask_sum_hw  # (N,1,1,1)
    mean = jnp.sum(outg, axis=(2, 3), keepdims=True) / msum
    gmax = jnp.max((outg + (mask - 1.0)).reshape(N, C_g, -1), axis=2)
    gmax = gmax.reshape(N, C_g, 1, 1)
    pooled = jnp.concatenate(
        [mean, mean * ((jnp.sqrt(msum) - 14.0) / 10.0), gmax], axis=1
    ).reshape(N, 3 * C_g)
    lin = pooled @ wlin
    return outr + lin[:, :, None, None]


if __name__ == "__main__":
    N, C_in, C_out, C_gpool, H, W = 2, 8, 32, 16, 16, 16

    key = jax.random.PRNGKey(0)
    kx, km, kp = jax.random.split(key, 3)

    x = jax.random.normal(kx, (N, C_in, H, W), jnp.float32)
    mask = (jax.random.uniform(km, (N, 1, H, W)) > 0.2).astype(jnp.float32)
    # precondition of the gpool-max trick: >= 1 unmasked position per element
    mask = mask.at[:, :, 0, 0].set(1.0)
    mask_sum_hw = jnp.sum(mask, axis=(2, 3), keepdims=True)  # (N,1,1,1)
    x = x * mask  # inputs are pre-masked, like in the real network

    params = make_params(kp, C_in, C_out, C_gpool, scale=1.0)

    out = conv_and_gpool(x, mask, mask_sum_hw, params)
    out = jax.block_until_ready(out)

    ref = reference(x, mask, mask_sum_hw, params)
    assert out.shape == (N, C_out, H, W)
    # bf16 MXU inputs (f32 accumulation) vs the pure-f32 reference.
    assert jnp.allclose(out, ref, rtol=2e-2, atol=2e-2), (
        float(jnp.max(jnp.abs(out - ref))))

    print("KERNEL_OK")
</pallas_src>

<mosaic_0001>
module attributes {stable_mosaic.version = 11 : i64} {
  func.func @conv_gpool_kernel(%arg0: i32, %arg1: memref<2xf32, #tpu.memory_space<smem>>, %arg2: memref<1x8x326xbf16, #tpu.memory_space<vmem>>, %arg3: memref<1x1x288xf32, #tpu.memory_space<vmem>>, %arg4: memref<9x48x8xbf16, #tpu.memory_space<vmem>>, %arg5: memref<16x1xf32, #tpu.memory_space<vmem>>, %arg6: memref<16x1xf32, #tpu.memory_space<vmem>>, %arg7: memref<32x48xf32, #tpu.memory_space<vmem>>, %arg8: memref<1x32x288xf32, #tpu.memory_space<vmem>>) attributes {dimension_semantics = [#tpu.dimension_semantics<parallel>], iteration_bounds = array<i64: 2>, scalar_prefetch = 1 : i64, scratch_operands = 0 : i64, tpu.core_type = #tpu.core_type<tc>, window_params = [{transform_indices = @transform_0, window_bounds = array<i64: 1, 8, 326>}, {transform_indices = @transform_1, window_bounds = array<i64: 1, 1, 288>}, {pipeline_mode = #tpu.pipeline_mode<synchronous>, transform_indices = @transform_2, window_bounds = array<i64: 9, 48, 8>}, {pipeline_mode = #tpu.pipeline_mode<synchronous>, transform_indices = @transform_3, window_bounds = array<i64: 16, 1>}, {pipeline_mode = #tpu.pipeline_mode<synchronous>, transform_indices = @transform_4, window_bounds = array<i64: 16, 1>}, {pipeline_mode = #tpu.pipeline_mode<synchronous>, transform_indices = @transform_5, window_bounds = array<i64: 32, 48>}, {transform_indices = @transform_6, window_bounds = array<i64: 1, 32, 288>}]} {
    %c1_i32 = arith.constant 1 : i32
    %0 = arith.muli %arg0, %c1_i32 : i32
    %c0 = arith.constant 0 : index
    %c0_0 = arith.constant 0 : index
    %1 = vector.load %arg5[%c0, %c0_0] : memref<16x1xf32, #tpu.memory_space<vmem>>, vector<16x1xf32>
    %c0_1 = arith.constant 0 : index
    %c0_2 = arith.constant 0 : index
    %2 = vector.load %arg6[%c0_1, %c0_2] : memref<16x1xf32, #tpu.memory_space<vmem>>, vector<16x1xf32>
    %c0_3 = arith.constant 0 : index
    %c0_4 = arith.constant 0 : index
    %c0_5 = arith.constant 0 : index
    %3 = vector.load %arg2[%c0_3, %c0_4, %c0_5] : memref<1x8x326xbf16, #tpu.memory_space<vmem>>, vector<1x8x326xbf16>
    %4 = vector.shape_cast %3 : vector<1x8x326xbf16> to vector<8x326xbf16>
    %c0_6 = arith.constant 0 : index
    %c0_7 = arith.constant 0 : index
    %c0_8 = arith.constant 0 : index
    %5 = vector.load %arg3[%c0_6, %c0_7, %c0_8] : memref<1x1x288xf32, #tpu.memory_space<vmem>>, vector<1x1x288xf32>
    %6 = vector.shape_cast %5 : vector<1x1x288xf32> to vector<1x288xf32>
    %7 = vector.extract_strided_slice %4 {offsets = [0, 0], sizes = [8, 288], strides = [1, 1]} : vector<8x326xbf16> to vector<8x288xbf16>
    %c0_9 = arith.constant 0 : index
    %c0_10 = arith.constant 0 : index
    %c0_11 = arith.constant 0 : index
    %8 = vector.load %arg4[%c0_9, %c0_10, %c0_11] : memref<9x48x8xbf16, #tpu.memory_space<vmem>>, vector<1x48x8xbf16>
    %9 = vector.shape_cast %8 : vector<1x48x8xbf16> to vector<48x8xbf16>
    %cst = arith.constant dense<0.000000e+00> : vector<48x288xf32>
    %10 = tpu.matmul %9, %7, %cst {dimension_numbers = #tpu.dot_dimension_numbers<[1], [0], [0], [1], [0, 0, 1, 1], [], []>} : vector<48x8xbf16>, vector<8x288xbf16>, vector<48x288xf32> -> vector<48x288xf32>
    %11 = vector.extract_strided_slice %4 {offsets = [0, 1], sizes = [8, 288], strides = [1, 1]} : vector<8x326xbf16> to vector<8x288xbf16>
    %c1 = arith.constant 1 : index
    %c0_12 = arith.constant 0 : index
    %c0_13 = arith.constant 0 : index
    %12 = vector.load %arg4[%c1, %c0_12, %c0_13] : memref<9x48x8xbf16, #tpu.memory_space<vmem>>, vector<1x48x8xbf16>
    %13 = vector.shape_cast %12 : vector<1x48x8xbf16> to vector<48x8xbf16>
    %cst_14 = arith.constant dense<0.000000e+00> : vector<48x288xf32>
    %14 = tpu.matmul %13, %11, %cst_14 {dimension_numbers = #tpu.dot_dimension_numbers<[1], [0], [0], [1], [0, 0, 1, 1], [], []>} : vector<48x8xbf16>, vector<8x288xbf16>, vector<48x288xf32> -> vector<48x288xf32>
    %15 = arith.addf %10, %14 : vector<48x288xf32>
    %16 = vector.extract_strided_slice %4 {offsets = [0, 2], sizes = [8, 288], strides = [1, 1]} : vector<8x326xbf16> to vector<8x288xbf16>
    %c2 = arith.constant 2 : index
    %c0_15 = arith.constant 0 : index
    %c0_16 = arith.constant 0 : index
    %17 = vector.load %arg4[%c2, %c0_15, %c0_16] : memref<9x48x8xbf16, #tpu.memory_space<vmem>>, vector<1x48x8xbf16>
    %18 = vector.shape_cast %17 : vector<1x48x8xbf16> to vector<48x8xbf16>
    %cst_17 = arith.constant dense<0.000000e+00> : vector<48x288xf32>
    %19 = tpu.matmul %18, %16, %cst_17 {dimension_numbers = #tpu.dot_dimension_numbers<[1], [0], [0], [1], [0, 0, 1, 1], [], []>} : vector<48x8xbf16>, vector<8x288xbf16>, vector<48x288xf32> -> vector<48x288xf32>
    %20 = arith.addf %15, %19 : vector<48x288xf32>
    %21 = vector.extract_strided_slice %4 {offsets = [0, 18], sizes = [8, 288], strides = [1, 1]} : vector<8x326xbf16> to vector<8x288xbf16>
    %c3 = arith.constant 3 : index
    %c0_18 = arith.constant 0 : index
    %c0_19 = arith.constant 0 : index
    %22 = vector.load %arg4[%c3, %c0_18, %c0_19] : memref<9x48x8xbf16, #tpu.memory_space<vmem>>, vector<1x48x8xbf16>
    %23 = vector.shape_cast %22 : vector<1x48x8xbf16> to vector<48x8xbf16>
    %cst_20 = arith.constant dense<0.000000e+00> : vector<48x288xf32>
    %24 = tpu.matmul %23, %21, %cst_20 {dimension_numbers = #tpu.dot_dimension_numbers<[1], [0], [0], [1], [0, 0, 1, 1], [], []>} : vector<48x8xbf16>, vector<8x288xbf16>, vector<48x288xf32> -> vector<48x288xf32>
    %25 = arith.addf %20, %24 : vector<48x288xf32>
    %26 = vector.extract_strided_slice %4 {offsets = [0, 19], sizes = [8, 288], strides = [1, 1]} : vector<8x326xbf16> to vector<8x288xbf16>
    %c4 = arith.constant 4 : index
    %c0_21 = arith.constant 0 : index
    %c0_22 = arith.constant 0 : index
    %27 = vector.load %arg4[%c4, %c0_21, %c0_22] : memref<9x48x8xbf16, #tpu.memory_space<vmem>>, vector<1x48x8xbf16>
    %28 = vector.shape_cast %27 : vector<1x48x8xbf16> to vector<48x8xbf16>
    %cst_23 = arith.constant dense<0.000000e+00> : vector<48x288xf32>
    %29 = tpu.matmul %28, %26, %cst_23 {dimension_numbers = #tpu.dot_dimension_numbers<[1], [0], [0], [1], [0, 0, 1, 1], [], []>} : vector<48x8xbf16>, vector<8x288xbf16>, vector<48x288xf32> -> vector<48x288xf32>
    %30 = arith.addf %25, %29 : vector<48x288xf32>
    %31 = vector.extract_strided_slice %4 {offsets = [0, 20], sizes = [8, 288], strides = [1, 1]} : vector<8x326xbf16> to vector<8x288xbf16>
    %c5 = arith.constant 5 : index
    %c0_24 = arith.constant 0 : index
    %c0_25 = arith.constant 0 : index
    %32 = vector.load %arg4[%c5, %c0_24, %c0_25] : memref<9x48x8xbf16, #tpu.memory_space<vmem>>, vector<1x48x8xbf16>
    %33 = vector.shape_cast %32 : vector<1x48x8xbf16> to vector<48x8xbf16>
    %cst_26 = arith.constant dense<0.000000e+00> : vector<48x288xf32>
    %34 = tpu.matmul %33, %31, %cst_26 {dimension_numbers = #tpu.dot_dimension_numbers<[1], [0], [0], [1], [0, 0, 1, 1], [], []>} : vector<48x8xbf16>, vector<8x288xbf16>, vector<48x288xf32> -> vector<48x288xf32>
    %35 = arith.addf %30, %34 : vector<48x288xf32>
    %36 = vector.extract_strided_slice %4 {offsets = [0, 36], sizes = [8, 288], strides = [1, 1]} : vector<8x326xbf16> to vector<8x288xbf16>
    %c6 = arith.constant 6 : index
    %c0_27 = arith.constant 0 : index
    %c0_28 = arith.constant 0 : index
    %37 = vector.load %arg4[%c6, %c0_27, %c0_28] : memref<9x48x8xbf16, #tpu.memory_space<vmem>>, vector<1x48x8xbf16>
    %38 = vector.shape_cast %37 : vector<1x48x8xbf16> to vector<48x8xbf16>
    %cst_29 = arith.constant dense<0.000000e+00> : vector<48x288xf32>
    %39 = tpu.matmul %38, %36, %cst_29 {dimension_numbers = #tpu.dot_dimension_numbers<[1], [0], [0], [1], [0, 0, 1, 1], [], []>} : vector<48x8xbf16>, vector<8x288xbf16>, vector<48x288xf32> -> vector<48x288xf32>
    %40 = arith.addf %35, %39 : vector<48x288xf32>
    %41 = vector.extract_strided_slice %4 {offsets = [0, 37], sizes = [8, 288], strides = [1, 1]} : vector<8x326xbf16> to vector<8x288xbf16>
    %c7 = arith.constant 7 : index
    %c0_30 = arith.constant 0 : index
    %c0_31 = arith.constant 0 : index
    %42 = vector.load %arg4[%c7, %c0_30, %c0_31] : memref<9x48x8xbf16, #tpu.memory_space<vmem>>, vector<1x48x8xbf16>
    %43 = vector.shape_cast %42 : vector<1x48x8xbf16> to vector<48x8xbf16>
    %cst_32 = arith.constant dense<0.000000e+00> : vector<48x288xf32>
    %44 = tpu.matmul %43, %41, %cst_32 {dimension_numbers = #tpu.dot_dimension_numbers<[1], [0], [0], [1], [0, 0, 1, 1], [], []>} : vector<48x8xbf16>, vector<8x288xbf16>, vector<48x288xf32> -> vector<48x288xf32>
    %45 = arith.addf %40, %44 : vector<48x288xf32>
    %46 = vector.extract_strided_slice %4 {offsets = [0, 38], sizes = [8, 288], strides = [1, 1]} : vector<8x326xbf16> to vector<8x288xbf16>
    %c8 = arith.constant 8 : index
    %c0_33 = arith.constant 0 : index
    %c0_34 = arith.constant 0 : index
    %47 = vector.load %arg4[%c8, %c0_33, %c0_34] : memref<9x48x8xbf16, #tpu.memory_space<vmem>>, vector<1x48x8xbf16>
    %48 = vector.shape_cast %47 : vector<1x48x8xbf16> to vector<48x8xbf16>
    %cst_35 = arith.constant dense<0.000000e+00> : vector<48x288xf32>
    %49 = tpu.matmul %48, %46, %cst_35 {dimension_numbers = #tpu.dot_dimension_numbers<[1], [0], [0], [1], [0, 0, 1, 1], [], []>} : vector<48x8xbf16>, vector<8x288xbf16>, vector<48x288xf32> -> vector<48x288xf32>
    %50 = arith.addf %45, %49 : vector<48x288xf32>
    %51 = vector.extract_strided_slice %50 {offsets = [0, 0], sizes = [32, 288], strides = [1, 1]} : vector<48x288xf32> to vector<32x288xf32>
    %52 = vector.extract_strided_slice %50 {offsets = [32, 0], sizes = [16, 288], strides = [1, 1]} : vector<48x288xf32> to vector<16x288xf32>
    %53 = vector.broadcast %1 : vector<16x1xf32> to vector<16x288xf32>
    %54 = arith.mulf %52, %53 : vector<16x288xf32>
    %55 = vector.broadcast %2 : vector<16x1xf32> to vector<16x288xf32>
    %56 = arith.addf %54, %55 : vector<16x288xf32>
    %57 = vector.broadcast %6 : vector<1x288xf32> to vector<16x288xf32>
    %58 = arith.mulf %56, %57 : vector<16x288xf32>
    %cst_36 = arith.constant 0.000000e+00 : f32
    %59 = vector.broadcast %cst_36 : f32 to vector<16x288xf32>
    %60 = arith.maximumf %58, %59 : vector<16x288xf32>
    %cst_37 = arith.constant dense<0.000000e+00> : vector<16xf32>
    %61 = vector.multi_reduction <add>, %60, %cst_37 [1] : vector<16x288xf32> to vector<16xf32>
    %62 = vector.shape_cast %61 : vector<16xf32> to vector<16x1xf32>
    %cst_38 = arith.constant 1.000000e+00 : f32
    %63 = vector.broadcast %cst_38 : f32 to vector<1x288xf32>
    %64 = arith.subf %6, %63 : vector<1x288xf32>
    %65 = vector.broadcast %64 : vector<1x288xf32> to vector<16x288xf32>
    %66 = arith.addf %60, %65 : vector<16x288xf32>
    %cst_39 = arith.constant dense<0xFF800000> : vector<16xf32>
    %67 = vector.multi_reduction <maximumf>, %66, %cst_39 [1] : vector<16x288xf32> to vector<16xf32>
    %68 = vector.shape_cast %67 : vector<16xf32> to vector<16x1xf32>
    %c0_i32 = arith.constant 0 : i32
    %69 = arith.addi %0, %c0_i32 : i32
    %70 = arith.index_cast %69 : i32 to index
    %71 = memref.load %arg1[%70] : memref<2xf32, #tpu.memory_space<smem>>
    %72 = vector.broadcast %71 : f32 to vector<1x1xf32>
    %73 = vector.broadcast %72 : vector<1x1xf32> to vector<16x1xf32>
    %74 = arith.divf %62, %73 : vector<16x1xf32>
    %75 = math.sqrt %72 : vector<1x1xf32>
    %cst_40 = arith.constant 1.400000e+01 : f32
    %76 = vector.broadcast %cst_40 : f32 to vector<1x1xf32>
    %77 = arith.subf %75, %76 : vector<1x1xf32>
    %cst_41 = arith.constant 1.000000e-01 : f32
    %78 = vector.broadcast %cst_41 : f32 to vector<1x1xf32>
    %79 = arith.mulf %77, %78 : vector<1x1xf32>
    %80 = vector.broadcast %79 : vector<1x1xf32> to vector<16x1xf32>
    %81 = arith.mulf %74, %80 : vector<16x1xf32>
    %82 = tpu.concatenate %74, %81, %68 in 0 : vector<16x1xf32>, vector<16x1xf32>, vector<16x1xf32> -> vector<48x1xf32>
    %c0_42 = arith.constant 0 : index
    %c0_43 = arith.constant 0 : index
    %83 = vector.load %arg7[%c0_42, %c0_43] : memref<32x48xf32, #tpu.memory_space<vmem>>, vector<32x48xf32>
    %cst_44 = arith.constant dense<0.000000e+00> : vector<32x1xf32>
    %84 = tpu.matmul %83, %82, %cst_44 {dimension_numbers = #tpu.dot_dimension_numbers<[1], [0], [0], [1], [0, 0, 1, 1], [], []>} : vector<32x48xf32>, vector<48x1xf32>, vector<32x1xf32> -> vector<32x1xf32>
    %85 = vector.broadcast %84 : vector<32x1xf32> to vector<32x288xf32>
    %86 = arith.addf %51, %85 : vector<32x288xf32>
    %c0_45 = arith.constant 0 : index
    %c0_46 = arith.constant 0 : index
    %c0_47 = arith.constant 0 : index
    %87 = vector.load %arg8[%c0_45, %c0_46, %c0_47] : memref<1x32x288xf32, #tpu.memory_space<vmem>>, vector<1x32x288xf32>
    %88 = vector.shape_cast %87 : vector<1x32x288xf32> to vector<32x288xf32>
    %89 = vector.shape_cast %86 : vector<32x288xf32> to vector<1x32x288xf32>
    tpu.vector_store %arg8[%c0_45, %c0_46, %c0_47], %89 {strides = array<i32>} : memref<1x32x288xf32, #tpu.memory_space<vmem>>, vector<1x32x288xf32>,
    return
  }
  func.func @transform_0(%arg0: i32, %arg1: memref<2xf32, #tpu.memory_space<smem>>) -> (i32, i32, i32) {
    %c0_i32 = arith.constant 0 : i32
    %c0_i32_0 = arith.constant 0 : i32
    %c0_i32_1 = arith.constant 0 : i32
    return %arg0, %c0_i32, %c0_i32_0 : i32, i32, i32
  }
  func.func @transform_1(%arg0: i32, %arg1: memref<2xf32, #tpu.memory_space<smem>>) -> (i32, i32, i32) {
    %c0_i32 = arith.constant 0 : i32
    %c0_i32_0 = arith.constant 0 : i32
    %c0_i32_1 = arith.constant 0 : i32
    return %arg0, %c0_i32, %c0_i32_0 : i32, i32, i32
  }
  func.func @transform_2(%arg0: i32, %arg1: memref<2xf32, #tpu.memory_space<smem>>) -> (i32, i32, i32) {
    %c0_i32 = arith.constant 0 : i32
    %c0_i32_0 = arith.constant 0 : i32
    %c0_i32_1 = arith.constant 0 : i32
    %c0_i32_2 = arith.constant 0 : i32
    return %c0_i32, %c0_i32_0, %c0_i32_1 : i32, i32, i32
  }
  func.func @transform_3(%arg0: i32, %arg1: memref<2xf32, #tpu.memory_space<smem>>) -> (i32, i32) {
    %c0_i32 = arith.constant 0 : i32
    %c0_i32_0 = arith.constant 0 : i32
    %c0_i32_1 = arith.constant 0 : i32
    return %c0_i32, %c0_i32_0 : i32, i32
  }
  func.func @transform_4(%arg0: i32, %arg1: memref<2xf32, #tpu.memory_space<smem>>) -> (i32, i32) {
    %c0_i32 = arith.constant 0 : i32
    %c0_i32_0 = arith.constant 0 : i32
    %c0_i32_1 = arith.constant 0 : i32
    return %c0_i32, %c0_i32_0 : i32, i32
  }
  func.func @transform_5(%arg0: i32, %arg1: memref<2xf32, #tpu.memory_space<smem>>) -> (i32, i32) {
    %c0_i32 = arith.constant 0 : i32
    %c0_i32_0 = arith.constant 0 : i32
    %c0_i32_1 = arith.constant 0 : i32
    return %c0_i32, %c0_i32_0 : i32, i32
  }
  func.func @transform_6(%arg0: i32, %arg1: memref<2xf32, #tpu.memory_space<smem>>) -> (i32, i32, i32) {
    %c0_i32 = arith.constant 0 : i32
    %c0_i32_0 = arith.constant 0 : i32
    %c0_i32_1 = arith.constant 0 : i32
    return %arg0, %c0_i32, %c0_i32_0 : i32, i32, i32
  }
}

</mosaic_0001>

<bundles_post_ra>
// kernel: tpu_custom_call.1
= control target key start
LH: loop header
LB: loop body
LE: loop exit
PB: predicated region body
PF: predicated region fallthrough
CT: control target
= control target key end

     0   :  { %s2217_s27 = smov [#allocation3]   ;;  %s2916_s0 = inlined_call_operand.vmem [shape: f32[2], index: 0, kind: input, shape index: {}]   ;;  %s2917_s1 = inlined_call_operand.vmem [shape: bf16[2,8,326], index: 1, kind: input, shape index: {}]   ;;  %s2918_s2 = inlined_call_operand.vmem [shape: f32[2,1,288], index: 2, kind: input, shape index: {}]   ;;  %s2919_s3 = inlined_call_operand.vmem [shape: bf16[9,48,8], index: 3, kind: input, shape index: {}]   ;;  %s2920_s4 = inlined_call_operand.vmem [shape: f32[16,1], index: 4, kind: input, shape index: {}]   ;;  %s2921_s5 = inlined_call_operand.vmem [shape: f32[16,1], index: 5, kind: input, shape index: {}]   ;;  %s2922_s6 = inlined_call_operand.vmem [shape: f32[32,48], index: 6, kind: input, shape index: {}]   ;;  %s2923_s7 = inlined_call_operand.hbm [shape: f32[2,32,288], index: 7, kind: output, shape index: {}]  }
   0x1   :  { %s13_s26 = sshll.u32 %s2916_s0, 4  ;;  %s14_s26 = int_to_ptr.vmem [resolvable:$true] %s13_s26 }
   0x2   :  { %16 = dma.vmem_to_smem %s14_s26, 16, %s2217_s27, [#allocation2] }
   0x3   :  { %2195 = dma.done.wait [#allocation2], 16 }
   0x4   :  { %2196 = vsyncadd [#allocation2], 4294967280 }
   0x5   :  { %19 = sfence }
   0x6   :  { %20 = vsyncpa [#allocation5], 0 }
   0x7   :  { %22 = vsyncpa [#allocation5 + $0x1], 0  ;;  %s2272_s28 = smov 0   ;;  %s2274_s29 = smov 0  }
   0x8   :  { %s2276_s30 = smov 0   ;;  %s2278_s8 = smov 0  }
   0x9 LB: > { %s2293_s0 = sadd.s32 4294967295, %s2215_s8   ;;  %s1799_s9 = sadd.s32 4294967294, %s2215_s8   ;;  %s2215_s8 = sphi %s2278_s8, %s2929_s8   ;;  %s2211_s30 = sphi %s2276_s30, %s2928_s30   ;;  %s2207_s29 = sphi %s2274_s29, %s2927_s29   ;;  %s2203_s28 = sphi %s2272_s28, %s2926_s28  }
   0xa   : > { %s2297_s10 = sadd.s32 1, %s2215_s8   ;;  %s171_s11 = sadd.s32 1, %s2211_s30 }
   0xb   : > { %s168_s12 = ssub.s32 %s2215_s8, %s2297_s10  ;;  %p181_p0 = scmp.ne.s32.totalorder %s2211_s30, %s2207_s29 }
   0xc   : > { %p169_p1 = scmp.eq.s32.totalorder %s168_s12, 0  ;;  %p182_p2 = scmp.eq.s32.totalorder %s2293_s0, 1 }
   0xd   : > { %p187_p3 = scmp.ne.s32.totalorder %s2207_s29, %s2203_s28  ;;  %p188_p4 = scmp.eq.s32.totalorder %s1799_s9, 1 }
   0xe   : > { %s2308_s13 = scalar_select %p169_p1, %s2211_s30, %s171_s11  }
   0xf   : > { %p2310_p5 = por %p182_p2, %p181_p0  ;;  %p2314_p6 = por %p188_p4, %p187_p3 }
  0x10   : > { %p1802_p7 = scmp.ge.s32.totalorder %s2215_s8, 1  ;;  %p233_p8 = scmp.lt.s32.totalorder %s2215_s8, 3 }
  0x12   : > { %p234_p9 = pnand %p1802_p7, %p233_p8 }
  0x13   : > { %p267_p10 = scmp.lt.s32.totalorder (!%p234_p9), %s2293_s0, 1  ;;  %s2218_s21 = smov (!%p234_p9), 127  }
  0x14   : > { %237 = sbr.rel (%p234_p9) target bundleno = 1043 (0x413), region = 44  ;;  %s2219_s22 = smov (!%p234_p9), 126  }
  0x15   : > { %s2220_s23 = smov (!%p234_p9), 110   ;;  %s2221_s24 = smov (!%p234_p9), 109  }
  0x16   : > { %s2222_s25 = smov (!%p234_p9), 108   ;;  %s2223_s26 = smov (!%p234_p9), 92  }
  0x17   : > { %s2224_s11 = smov (!%p234_p9), 91   ;;  %s2225_s12 = smov (!%p234_p9), 90  }
  0x18   : > { %s264_s19 = sand.u32 (!%p234_p9), 1, %s2207_s29  }
  0x19   : > { %s2322_s16 = scalar_select %p267_p10, %s2293_s0, 1  ;;  %vm339_vm0 = vcmask 1043456   ;;  %v2357_v9 = vld [vmem:[%s2919_s3] sm:$0xff]  ;;  %vm329_vm1 = vcmask 64512   ;;  %v2367_v10 = vld [vmem:[%s2919_s3 + $0x8] sm:$0xff]  ;;  %vm326_vm2 = vcmask 1039360  }
  0x1a   : > { %v2053_v16 = vld [vmem:[%s2919_s3 + $0x18] sm:$0xff]  ;;  %v2382_v19 = vld [vmem:[%s2919_s3 + $0x10] sm:$0xff]  ;;  %vm554_vm3 = vcmask 1031168   ;;  %v2054_v31 = vld [vmem:[%s2919_s3 + $0x20] sm:$0xff]  ;;  %vm693_vm4 = vcmask 900096   ;;  %vm832_vm5 = vcmask 891904  }
  0x1b   : > { %s2078_s17 = smul.u32 12, %s2322_s16  ;;  %v2056_v32 = vld [vmem:[%s2919_s3 + $0x30] sm:$0xff]  ;;  %v2055_v33 = vld [vmem:[%s2919_s3 + $0x28] sm:$0xff]  ;;  %v2414_v34 = vld [vmem:[%s2919_s3 + $0x38] sm:$0xff]  ;;  %vm971_vm6 = vcmask 883712   ;;  %vm1110_vm7 = vcmask 752640  }
  0x1c   : > { %v2428_v37 = vld [vmem:[%s2919_s3 + $0x40] sm:$0xff]  ;;  %v2059_v44 = vld [vmem:[%s2919_s3 + $0x48] sm:$0xff]  ;;  %v2060_v45 = vld [vmem:[%s2919_s3 + $0x50] sm:$0xff]  ;;  %vm1249_vm8 = vcmask 744448   ;;  %vm1388_vm9 = vcmask 736256   ;;  %vm1551_vm10 = vcmask 261120  }
  0x1d   : > { %s271_s20 = scalar_lea.vmem %s2917_s1, %s2078_s17  ;;  %v2061_v46 = vld [vmem:[%s2919_s3 + $0x58] sm:$0xff]  ;;  %s2171_s17 = scalar_lea.hbm %s2923_s7, 192 }
  0x1e   : > { %v282_v0 = vld [vmem:[%s271_s20 + $0x8] sm:$0xf]  ;;  %v281_v1 = vld [vmem:[%s271_s20] sm:$0xff]  ;;  %v2474_v61 = vld [vmem:[%s2919_s3 + $0x78] sm:$0xff]  ;;  %s2077_s20 = smul.u32 96, %s264_s19 }
  0x1f   : > { %v316_v2 = vunpack.c.l.b16 %v282_v0  ;;  %v315_v3 = vunpack.c.h.b16 %v281_v1  ;;  %v314_v6 = vunpack.c.l.b16 %v281_v1 }
  0x21   : > { %v2328_v4 = vpack.c.b16 %v316_v2, %v316_v2  ;;  %v2330_v5 = vpack.c.b16 %v315_v3, %v315_v3  ;;  %v2335_v7 = vpack.c.b16 %v314_v6, %v314_v6  ;;  %v2489_v2 = vld [vmem:[%s2919_s3 + $0x80] sm:$0xff] }
  0x23   : > { %324 = vrot.lane.b32.xlu0 %v2328_v4, %s2218_s21  ;;  %322 = vrot.lane.b32.xlu1 %v2330_v5, %s2218_s21  ;;  %v446_v8 = vsel %vm339_vm0, %v2335_v7, 0  ;;  %v449_v29 = vsel %vm339_vm0, %v2330_v5, 0  ;;  %v452_v30 = vsel %vm339_vm0, %v2328_v4, 0 }
  0x24   : > { %550 = vrot.lane.b32.xlu2 %v2330_v5, %s2219_s22  ;;  %461 = vmatpush.bf16.msra.mxu3 %v446_v8 }
  0x27   : > { %1843 = vmatmul.msk.bf16.vlgmr.msra.gmra.mxu3 %vm329_vm1, %v2357_v9 }
  0x2b   : > { %320 = vrot.lane.b32.xlu0 %v2335_v7, %s2218_s21  ;;  %548 = vrot.lane.b32.xlu1 %v2335_v7, %s2219_s22  ;;  %s2079_s21 = smul.u32 3, %s2322_s16  ;;  %s1585_s16 = sld [smem:[#allocation3 + %s2293_s0]] }
  0x2c   : > { %552 = vrot.lane.b32.xlu2 %v2328_v4, %s2219_s22  ;;  %s2080_s22 = smul.u32 96, %s2293_s0  ;;  %s1710_s0 = scalar_lea.sflag [#allocation5], %s264_s19 }
  0x33   : > { %691 = vrot.lane.b32.xlu1 %v2328_v4, %s2220_s23  ;;  %689 = vrot.lane.b32.xlu0 %v2330_v5, %s2220_s23 }
  0x34   : > { %687 = vrot.lane.b32.xlu2 %v2335_v7, %s2220_s23 }
  0x37   : > { %1844 = vmatmul.msk.bf16.gmra.mxu3 %vm329_vm1, %v2367_v10 }
  0x3b   : > { %830 = vrot.lane.b32.xlu0 %v2328_v4, %s2221_s24  ;;  %826 = vrot.lane.b32.xlu1 %v2335_v7, %s2221_s24 }
  0x3c   : > { %828 = vrot.lane.b32.xlu2 %v2330_v5, %s2221_s24  ;;  %s275_s24 = scalar_lea.vmem %s2918_s2, %s2079_s21  ;;  %s266_s21 = scalar_lea.vmem [#allocation4], %s2077_s20 }
  0x43   : > { %967 = vrot.lane.b32.xlu1 %v2330_v5, %s2222_s25  ;;  %965 = vrot.lane.b32.xlu0 %v2335_v7, %s2222_s25 }
  0x44   : > { %1104 = vrot.lane.b32.xlu2 %v2335_v7, %s2223_s26 }
  0x47   : > { %1845 = vmatmul.msk.bf16.gmra.mxu3 %vm329_vm1, %v2382_v19 }
  0x4b   : > { %969 = vrot.lane.b32.xlu1 %v2328_v4, %s2222_s25  ;;  %1106 = vrot.lane.b32.xlu0 %v2330_v5, %s2223_s26  ;;  %s1722_s25 = sshll.u32 %s266_s21, 4  ;;  %s1723_s25 = int_to_ptr.vmem [resolvable:$true] %s1722_s25 }
  0x4c   : > { %1108 = vrot.lane.b32.xlu2 %v2328_v4, %s2223_s26 }
  0x53   : > { %1247 = vrot.lane.b32.xlu1 %v2328_v4, %s2224_s11  ;;  %1245 = vrot.lane.b32.xlu0 %v2330_v5, %s2224_s11 }
  0x54   : > { %1243 = vrot.lane.b32.xlu2 %v2335_v7, %s2224_s11 }
  0x5b   : > { %1386 = vrot.lane.b32.xlu0 %v2328_v4, %s2225_s12  ;;  %1382 = vrot.lane.b32.xlu1 %v2335_v7, %s2225_s12 }
  0x5c   : > { %1384 = vrot.lane.b32.xlu2 %v2330_v5, %s2225_s12 }
  0x7e   : > { %v551_v11 = vpop.permute.xlu2 %550 }
  0x86   : > { %v553_v18 = vpop.permute.xlu2 %552 }
  0x87   : > { %v556_v20 = vsel %vm554_vm3, %v551_v11, %v553_v18  ;;  %v573_v28 = vsel %vm339_vm0, %v553_v18, 0 }
  0x88   : > { %v570_v23 = vsel %vm339_vm0, %v556_v20, 0 }
  0x89   : > { %606 = vmatpush.bf16.msrb.mxu3 %v570_v23 }
  0x8c   : > { %1873 = vmatmul.msk.bf16.vlgmr.msrb.gmra.mxu3 %vm329_vm1, %v2056_v32 }
  0x8e   : > { %v688_v35 = vpop.permute.xlu2 %687 }
  0x95   : > { %v325_v12 = vpop.permute.xlu0 %324  ;;  %v323_v13 = vpop.permute.xlu1 %322 }
  0x96   : > { %v347_v14 = vsel %vm339_vm0, %v325_v12, 0  ;;  %v328_v15 = vsel %vm326_vm2, %v323_v13, %v325_v12  ;;  %v829_v47 = vpop.permute.xlu2 %828 }
  0x97   : > { %404 = vmatpush.bf16.msra.mxu2 %v347_v14  ;;  %v344_v17 = vsel %vm339_vm0, %v328_v15, 0 }
  0x98   : > { %380 = vmatpush.bf16.msra.mxu1 %v344_v17 }
  0x9a   : > { %1828 = vmatmul.msk.bf16.vlgmr.msra.gmra.mxu2 %vm329_vm1, %v2053_v16 }
  0x9b   : > { %1825 = vmatmul.msk.bf16.vlgmr.msra.gmra.mxu1 %vm329_vm1, %v2053_v16 }
  0x9c   : > { %509 = vmatpush.bf16.msrb.mxu1 %v452_v30  ;;  %1874 = vmatmul.msk.bf16.gmra.mxu3 %vm329_vm1, %v2414_v34 }
  0x9d   : > { %v321_v21 = vpop.permute.xlu0 %320  ;;  %v549_v22 = vpop.permute.xlu1 %548 }
  0x9e   : > { %v327_v24 = vsel %vm326_vm2, %v321_v21, %v323_v13  ;;  %v555_v25 = vsel %vm554_vm3, %v549_v22, %v551_v11  ;;  %v1105_v7 = vpop.permute.xlu2 %1104 }
  0x9f   : > { %v341_v26 = vsel %vm339_vm0, %v327_v24, 0  ;;  %v567_v27 = vsel %vm339_vm0, %v555_v25, 0  ;;  %v2518_v25 = vld [vmem:[%s2919_s3 + $0x88] sm:$0xff] }
  0xa0   : > { %356 = vmatpush.bf16.msra.mxu0 %v341_v26  ;;  %582 = vmatpush.bf16.msrb.mxu2 %v567_v27 }
  0xa3   : > { %1822 = vmatmul.msk.bf16.vlgmr.msra.gmra.mxu0 %vm329_vm1, %v2053_v16 }
  0xa4   : > { %485 = vmatpush.bf16.msrb.mxu0 %v449_v29 }
  0xa5   : > { %v692_v36 = vpop.permute.xlu1 %691  ;;  %v690_v39 = vpop.permute.xlu0 %689 }
  0xa6   : > { %v712_v38 = vsel %vm339_vm0, %v692_v36, 0  ;;  %v694_v40 = vsel %vm693_vm4, %v688_v35, %v690_v39  ;;  %v695_v41 = vsel %vm693_vm4, %v690_v39, %v692_v36  ;;  %v1109_v18 = vpop.permute.xlu2 %1108 }
  0xa7   : > { %769 = vmatpush.bf16.msra.mxu3 %v712_v38  ;;  %v706_v42 = vsel %vm339_vm0, %v694_v40, 0  ;;  %v709_v43 = vsel %vm339_vm0, %v695_v41, 0  ;;  %v1129_v29 = vsel %vm339_vm0, %v1109_v18, 0  ;;  %v2542_v38 = vld [vmem:[%s2919_s3 + $0x90] sm:$0xff] }
  0xa8   : > { %630 = vmatpush.bf16.msra.mxu0 %v573_v28  ;;  %721 = vmatpush.bf16.msra.mxu1 %v706_v42 }
  0xa9   : > { %745 = vmatpush.bf16.msra.mxu2 %v709_v43 }
  0xaa   : > { %1829 = vmatmul.msk.bf16.gmra.mxu2 %vm329_vm1, %v2054_v31  ;;  %v463_v52 = vpop.f32.mrf.mxu3 }
  0xab   : > { %1826 = vmatmul.msk.bf16.gmra.mxu1 %vm329_vm1, %v2054_v31 }
  0xac   : > { %1875 = vmatmul.msk.bf16.gmra.mxu3 %vm329_vm1, %v2428_v37 }
  0xad   : > { %v831_v48 = vpop.permute.xlu0 %830  ;;  %v827_v53 = vpop.permute.xlu1 %826 }
  0xae   : > { %v834_v49 = vsel %vm832_vm5, %v829_v47, %v831_v48  ;;  %v851_v50 = vsel %vm339_vm0, %v831_v48, 0  ;;  %v833_v54 = vsel %vm832_vm5, %v827_v53, %v829_v47 }
  0xaf   : > { %v848_v51 = vsel %vm339_vm0, %v834_v49, 0  ;;  %v845_v55 = vsel %vm339_vm0, %v833_v54, 0 }
  0xb2   : > { %v465_v56 = vpop.f32.mrf.mxu3 }
  0xb3   : > { %1823 = vmatmul.msk.bf16.gmra.mxu0 %vm329_vm1, %v2054_v31 }
  0xb5   : > { %v968_v57 = vpop.permute.xlu1 %967  ;;  %v966_v58 = vpop.permute.xlu0 %965 }
  0xb6   : > { %v972_v59 = vsel %vm971_vm6, %v966_v58, %v968_v57 }
  0xb7   : > { %v984_v60 = vsel %vm339_vm0, %v972_v59, 0 }
  0xb8   : > { %999 = vmatpush.bf16.msrb.mxu3 %v984_v60 }
  0xba   : > { %1830 = vmatmul.msk.bf16.gmra.mxu2 %vm329_vm1, %v2055_v33  ;;  %v468_v62 = vpop.f32.mrf.mxu3 }
  0xbb   : > { %1827 = vmatmul.msk.bf16.gmra.mxu1 %vm329_vm1, %v2055_v33 }
  0xbc   : > { %1903 = vmatmul.msk.bf16.vlgmr.msra.gmra.mxu3 %vm329_vm1, %v2059_v44 }
  0xbd   : > { %v970_v14 = vpop.permute.xlu1 %969 }
  0xbe   : > { %v973_v15 = vsel %vm971_vm6, %v968_v57, %v970_v14  ;;  %v990_v16 = vsel %vm339_vm0, %v970_v14, 0 }
  0xbf   : > { %v987_v17 = vsel %vm339_vm0, %v973_v15, 0 }
  0xc2   : > { %v470_v0 = vpop.f32.mrf.mxu3 }
  0xc3   : > { %1824 = vmatmul.msk.bf16.gmra.mxu0 %vm329_vm1, %v2055_v33 }
  0xca   : > { %1870 = vmatmul.msk.bf16.vlgmr.msrb.gmra.mxu2 %vm329_vm1, %v2056_v32  ;;  %v473_v6 = vpop.f32.mrf.mxu3 }
  0xcb   : > { %1849 = vmatmul.msk.bf16.vlgmr.msrb.gmra.mxu1 %vm329_vm1, %v2357_v9  ;;  %908 = vmatpush.bf16.msrb.mxu2 %v851_v50 }
  0xcc   : > { %1904 = vmatmul.msk.bf16.gmra.mxu3 %vm329_vm1, %v2060_v45  ;;  %884 = vmatpush.bf16.msrb.mxu1 %v848_v51  ;;  %v2566_v51 = vld [vmem:[%s2919_s3 + $0x98] sm:$0xff] }
  0xd2   : > { %v475_v13 = vpop.f32.mrf.mxu3 }
  0xd3   : > { %1846 = vmatmul.msk.bf16.vlgmr.msrb.gmra.mxu0 %vm329_vm1, %v2357_v9  ;;  %v2062_v9 = vld [vmem:[%s2919_s3 + $0x60] sm:$0xff] }
  0xd4   : > { %860 = vmatpush.bf16.msrb.mxu0 %v845_v55 }
  0xda   : > { %1871 = vmatmul.msk.bf16.gmra.mxu2 %vm329_vm1, %v2414_v34 }
  0xdb   : > { %1850 = vmatmul.msk.bf16.gmra.mxu1 %vm329_vm1, %v2367_v10 }
  0xdc   : > { %1905 = vmatmul.msk.bf16.gmra.mxu3 %vm329_vm1, %v2061_v46 }
  0xe3   : > { %1847 = vmatmul.msk.bf16.gmra.mxu0 %vm329_vm1, %v2367_v10 }
  0xea   : > { %1872 = vmatmul.msk.bf16.gmra.mxu2 %vm329_vm1, %v2428_v37 }
  0xeb   : > { %1851 = vmatmul.msk.bf16.gmra.mxu1 %vm329_vm1, %v2382_v19 }
  0xec   : > { %1951 = vmatmul.msk.bf16.vlgmr.msrb.gmra.mxu3 %vm329_vm1, %v2474_v61 }
  0xf3   : > { %1848 = vmatmul.msk.bf16.gmra.mxu0 %vm329_vm1, %v2382_v19  ;;  %v1107_v19 = vpop.permute.xlu0 %1106 }
  0xf4   : > { %v1111_v20 = vsel %vm1110_vm7, %v1105_v7, %v1107_v19  ;;  %v1112_v21 = vsel %vm1110_vm7, %v1107_v19, %v1109_v18  ;;  %v1248_v7 = vpop.permute.xlu1 %1247 }
  0xf5   : > { %v1123_v23 = vsel %vm339_vm0, %v1111_v20, 0  ;;  %v1126_v24 = vsel %vm339_vm0, %v1112_v21, 0 }
  0xf6   : > { %1162 = vmatpush.bf16.msra.mxu3 %v1126_v24 }
  0xfa   : > { %1900 = vmatmul.msk.bf16.vlgmr.msra.gmra.mxu2 %vm329_vm1, %v2059_v44 }
  0xfb   : > { %1897 = vmatmul.msk.bf16.vlgmr.msra.gmra.mxu1 %vm329_vm1, %v2059_v44  ;;  %1138 = vmatpush.bf16.msra.mxu2 %v1123_v23  ;;  %v2064_v44 = vld [vmem:[%s2919_s3 + $0x70] sm:$0xff] }
  0xfc   : > { %1952 = vmatmul.msk.bf16.gmra.mxu3 %vm329_vm1, %v2489_v2  ;;  %1047 = vmatpush.bf16.msra.mxu1 %v990_v16 }
 0x103   : > { %1876 = vmatmul.msk.bf16.vlgmr.msra.gmra.mxu0 %vm329_vm1, %v2056_v32  ;;  %v2063_v32 = vld [vmem:[%s2919_s3 + $0x68] sm:$0xff] }
 0x104   : > { %1023 = vmatpush.bf16.msra.mxu0 %v987_v17 }
 0x10a   : > { %1901 = vmatmul.msk.bf16.gmra.mxu2 %vm329_vm1, %v2060_v45 }
 0x10b   : > { %1898 = vmatmul.msk.bf16.gmra.mxu1 %vm329_vm1, %v2060_v45 }
 0x10c   : > { %1953 = vmatmul.msk.bf16.gmra.mxu3 %vm329_vm1, %v2518_v25 }
 0x10f   : > { %v608_v30 = vpop.f32.mrf.mxu3 }
 0x113   : > { %1877 = vmatmul.msk.bf16.gmra.mxu0 %vm329_vm1, %v2414_v34 }
 0x117   : > { %v610_v36 = vpop.f32.mrf.mxu3 }
 0x118   : > { %v2480_v63 = vpop.f32.mrf.mxu1 }
 0x11a   : > { %1902 = vmatmul.msk.bf16.gmra.mxu2 %vm329_vm1, %v2061_v46 }
 0x11b   : > { %1899 = vmatmul.msk.bf16.gmra.mxu1 %vm329_vm1, %v2061_v46 }
 0x11c   : > { %1981 = vmatmul.msk.bf16.vlgmr.msra.gmra.mxu3 %vm329_vm1, %v2542_v38 }
 0x11d   : > { %v2484_v1 = vpop.f32.mrf.mxu2 }
 0x11f   : > { %v613_v42 = vpop.f32.mrf.mxu3 }
 0x120   : > { %v358_v3 = vpop.f32.mrf.mxu0  ;;  %v2493_v4 = vpop.f32.mrf.mxu1 }
 0x121   : > { %v2495_v5 = vadd.f32 %v463_v52, %v358_v3 }
 0x123   : > { %1878 = vmatmul.msk.bf16.gmra.mxu0 %vm329_vm1, %v2428_v37 }
 0x125   : > { %v2499_v8 = vpop.f32.mrf.mxu2 }
 0x127   : > { %v615_v49 = vpop.f32.mrf.mxu3 }
 0x128   : > { %v360_v10 = vpop.f32.mrf.mxu0  ;;  %v2504_v11 = vpop.f32.mrf.mxu1 }
 0x129   : > { %v2506_v12 = vadd.f32 %v465_v56, %v360_v10 }
 0x12a   : > { %1930 = vmatmul.msk.bf16.vlgmr.msrb.gmra.mxu2 %vm329_vm1, %v2062_v9 }
 0x12b   : > { %1927 = vmatmul.msk.bf16.vlgmr.msrb.gmra.mxu1 %vm329_vm1, %v2062_v9 }
 0x12c   : > { %1982 = vmatmul.msk.bf16.gmra.mxu3 %vm329_vm1, %v2566_v51 }
 0x12d   : > { %v411_v22 = vpop.f32.mrf.mxu2 }
 0x12f   : > { %v618_v57 = vpop.f32.mrf.mxu3 }
 0x130   : > { %v363_v26 = vpop.f32.mrf.mxu0  ;;  %v2522_v27 = vpop.f32.mrf.mxu1 }
 0x131   : > { %v469_v28 = vadd.f32 %v468_v62, %v363_v26 }
 0x133   : > { %1924 = vmatmul.msk.bf16.vlgmr.msrb.gmra.mxu0 %vm329_vm1, %v2062_v9  ;;  %v1246_v9 = vpop.permute.xlu0 %1245 }
 0x134   : > { %1186 = vmatpush.bf16.msrb.mxu0 %v1129_v29 }
 0x135   : > { %v2526_v31 = vpop.f32.mrf.mxu2 }
 0x138   : > { %v365_v33 = vpop.f32.mrf.mxu0  ;;  %v2531_v34 = vpop.f32.mrf.mxu1 }
 0x139   : > { %v2533_v35 = vadd.f32 %v470_v0, %v365_v33 }
 0x13a   : > { %1931 = vmatmul.msk.bf16.gmra.mxu2 %vm329_vm1, %v2063_v32 }
 0x13b   : > { %1928 = vmatmul.msk.bf16.gmra.mxu1 %vm329_vm1, %v2063_v32 }
 0x13d   : > { %v2537_v37 = vpop.f32.mrf.mxu2 }
 0x140   : > { %v368_v39 = vpop.f32.mrf.mxu0  ;;  %v2546_v40 = vpop.f32.mrf.mxu1 }
 0x141   : > { %v2548_v41 = vadd.f32 %v473_v6, %v368_v39  ;;  %v1244_v6 = vpop.permute.xlu2 %1243 }
 0x143   : > { %1925 = vmatmul.msk.bf16.gmra.mxu0 %vm329_vm1, %v2063_v32  ;;  %v2071_v32 = vld [vmem:[%s2919_s3 + $0xa8] sm:$0xff] }
 0x145   : > { %v2551_v43 = vpop.f32.mrf.mxu2 }
 0x148   : > { %v370_v45 = vpop.f32.mrf.mxu0  ;;  %v511_v46 = vpop.f32.mrf.mxu1 }
 0x149   : > { %v2556_v47 = vadd.f32 %v475_v13, %v370_v45  ;;  %v2559_v48 = vadd.f32 %v511_v46, %v2484_v1  ;;  %v1251_v13 = vsel %vm1249_vm8, %v1246_v9, %v1248_v7 }
 0x14a   : > { %1932 = vmatmul.msk.bf16.gmra.mxu2 %vm329_vm1, %v2064_v44  ;;  %v1265_v16 = vsel %vm339_vm0, %v1251_v13, 0 }
 0x14b   : > { %1929 = vmatmul.msk.bf16.gmra.mxu1 %vm329_vm1, %v2064_v44  ;;  %1301 = vmatpush.bf16.msrb.mxu2 %v1265_v16 }
 0x14d   : > { %v584_v50 = vpop.f32.mrf.mxu2 }
 0x14e   : > { %v2569_v52 = vadd.f32 %v584_v50, %v2495_v5  ;;  %v620_v5 = vpop.f32.mrf.mxu3 }
 0x150   : > { %v487_v53 = vpop.f32.mrf.mxu0  ;;  %v513_v54 = vpop.f32.mrf.mxu1 }
 0x151   : > { %v488_v55 = vadd.f32 %v487_v53, %v2480_v63  ;;  %v2575_v56 = vadd.f32 %v513_v54, %v2499_v8  ;;  %v1268_v8 = vsel %vm339_vm0, %v1248_v7, 0  ;;  %v1387_v7 = vpop.permute.xlu0 %1386 }
 0x152   : > { %1325 = vmatpush.bf16.msrb.mxu3 %v1268_v8 }
 0x153   : > { %v2577_v58 = vadd.f32 %v608_v30, %v488_v55  ;;  %1926 = vmatmul.msk.bf16.gmra.mxu0 %vm329_vm1, %v2064_v44 }
 0x155   : > { %v586_v59 = vpop.f32.mrf.mxu2 }
 0x156   : > { %v2581_v60 = vadd.f32 %v586_v59, %v2506_v12  ;;  %v1250_v12 = vsel %vm1249_vm8, %v1244_v6, %v1246_v9  ;;  %v2606_v21 = vpop.f32.mrf.mxu3 }
 0x157   : > { %v1262_v15 = vsel %vm339_vm0, %v1250_v12, 0 }
 0x158   : > { %v489_v62 = vpop.f32.mrf.mxu0  ;;  %v516_v0 = vpop.f32.mrf.mxu1  ;;  %1277 = vmatpush.bf16.msrb.mxu1 %v1262_v15 }
 0x159   : > { %v490_v1 = vadd.f32 %v489_v62, %v2493_v4  ;;  %v2584_v3 = vadd.f32 %v516_v0, %v411_v22  ;;  %v2596_v4 = vld [vmem:[%s2919_s3 + $0xa0] sm:$0xff]  ;;  %v1383_v15 = vpop.permute.xlu1 %1382 }
 0x15a   : > { %1978 = vmatmul.msk.bf16.vlgmr.msra.gmra.mxu2 %vm329_vm1, %v2542_v38  ;;  %1983 = vmatmul.msk.bf16.gmra.mxu3 %vm329_vm1, %v2596_v4 }
 0x15b   : > { %v2588_v63 = vadd.f32 %v610_v36, %v490_v1  ;;  %1957 = vmatmul.msk.bf16.vlgmr.msra.gmra.mxu1 %vm329_vm1, %v2474_v61 }
 0x15d   : > { %v589_v10 = vpop.f32.mrf.mxu2 }
 0x15e   : > { %v653_v14 = vadd.f32 %v589_v10, %v469_v28 }
 0x160   : > { %v492_v17 = vpop.f32.mrf.mxu0  ;;  %v518_v18 = vpop.f32.mrf.mxu1 }
 0x161   : > { %v493_v19 = vadd.f32 %v492_v17, %v2504_v11  ;;  %v2604_v20 = vadd.f32 %v518_v18, %v2526_v31  ;;  %v2617_v11 = vpop.f32.mrf.mxu3 }
 0x163   : > { %v654_v22 = vadd.f32 %v613_v42, %v493_v19  ;;  %1954 = vmatmul.msk.bf16.vlgmr.msra.gmra.mxu0 %vm329_vm1, %v2474_v61 }
 0x165   : > { %v591_v23 = vpop.f32.mrf.mxu2 }
 0x166   : > { %v2611_v24 = vadd.f32 %v591_v23, %v2533_v35 }
 0x168   : > { %v494_v26 = vpop.f32.mrf.mxu0  ;;  %v521_v28 = vpop.f32.mrf.mxu1 }
 0x169   : > { %v495_v29 = vadd.f32 %v494_v26, %v2522_v27  ;;  %v2615_v30 = vadd.f32 %v521_v28, %v2537_v37  ;;  %v2636_v39 = vpop.f32.mrf.mxu3 }
 0x16a   : > { %1979 = vmatmul.msk.bf16.gmra.mxu2 %vm329_vm1, %v2566_v51  ;;  %2011 = vmatmul.msk.bf16.vlgmr.msrb.gmra.mxu3 %vm329_vm1, %v2071_v32 }
 0x16b   : > { %v2621_v31 = vadd.f32 %v615_v49, %v495_v29  ;;  %1958 = vmatmul.msk.bf16.gmra.mxu1 %vm329_vm1, %v2489_v2 }
 0x16d   : > { %v594_v61 = vpop.f32.mrf.mxu2 }
 0x16e   : > { %v2629_v27 = vadd.f32 %v594_v61, %v2548_v41 }
 0x170   : > { %v497_v33 = vpop.f32.mrf.mxu0  ;;  %v523_v35 = vpop.f32.mrf.mxu1 }
 0x171   : > { %v498_v36 = vadd.f32 %v497_v33, %v2531_v34  ;;  %v2634_v37 = vadd.f32 %v523_v35, %v2551_v43  ;;  %v2649_v43 = vpop.f32.mrf.mxu3 }
 0x173   : > { %v2638_v42 = vadd.f32 %v618_v57, %v498_v36  ;;  %1955 = vmatmul.msk.bf16.gmra.mxu0 %vm329_vm1, %v2489_v2 }
 0x175   : > { %v596_v44 = vpop.f32.mrf.mxu2 }
 0x176   : > { %v2643_v41 = vadd.f32 %v596_v44, %v2556_v47  ;;  %v2072_v47 = vld [vmem:[%s2919_s3 + $0xb0] sm:$0xff] }
 0x178   : > { %v499_v45 = vpop.f32.mrf.mxu0  ;;  %v723_v46 = vpop.f32.mrf.mxu1 }
 0x179   : > { %v500_v49 = vadd.f32 %v499_v45, %v2546_v40  ;;  %v2647_v34 = vadd.f32 %v723_v46, %v2569_v52  ;;  %v781_v57 = vpop.f32.mrf.mxu3 }
 0x17a   : > { %1980 = vmatmul.msk.bf16.gmra.mxu2 %vm329_vm1, %v2596_v4  ;;  %2012 = vmatmul.msk.bf16.gmra.mxu3 %vm329_vm1, %v2072_v47 }
 0x17b   : > { %v663_v50 = vadd.f32 %v620_v5, %v500_v49  ;;  %1959 = vmatmul.msk.bf16.gmra.mxu1 %vm329_vm1, %v2518_v25 }
 0x17d   : > { %v747_v2 = vpop.f32.mrf.mxu2 }
 0x17e   : > { %v787_v53 = vadd.f32 %v747_v2, %v2577_v58 }
 0x180   : > { %v632_v40 = vpop.f32.mrf.mxu0  ;;  %v725_v52 = vpop.f32.mrf.mxu1 }
 0x181   : > { %v649_v54 = vadd.f32 %v632_v40, %v2559_v48  ;;  %v2662_v55 = vadd.f32 %v725_v52, %v2581_v60  ;;  %v783_v6 = vpop.f32.mrf.mxu3  ;;  %v1385_v48 = vpop.permute.xlu2 %1384 }
 0x182   : > { %v1390_v8 = vsel %vm1388_vm9, %v1385_v48, %v1387_v7  ;;  %v1389_v16 = vsel %vm1388_vm9, %v1383_v15, %v1385_v48 }
 0x183   : > { %1956 = vmatmul.msk.bf16.gmra.mxu0 %vm329_vm1, %v2518_v25  ;;  %v2073_v25 = vld [vmem:[%s2919_s3 + $0xb8] sm:$0xff]  ;;  %v1404_v12 = vsel %vm339_vm0, %v1390_v8, 0  ;;  %v1401_v18 = vsel %vm339_vm0, %v1389_v16, 0 }
 0x184   : > { %1440 = vmatpush.bf16.msra.mxu1 %v1404_v12  ;;  %1416 = vmatpush.bf16.msra.mxu0 %v1401_v18 }
 0x185   : > { %v749_v59 = vpop.f32.mrf.mxu2 }
 0x186   : > { %v2667_v62 = vadd.f32 %v749_v59, %v2588_v63 }
 0x188   : > { %v634_v0 = vpop.f32.mrf.mxu0  ;;  %v728_v1 = vpop.f32.mrf.mxu1 }
 0x189   : > { %v2670_v58 = vadd.f32 %v634_v0, %v2575_v56  ;;  %v2672_v5 = vadd.f32 %v728_v1, %v653_v14  ;;  %v1407_v56 = vsel %vm339_vm0, %v1387_v7, 0  ;;  %v1001_v17 = vpop.f32.mrf.mxu3  ;;  %v277_v7 = vld [vmem:[%s2920_s4] sm:$0xff] }
 0x18a   : > { %2008 = vmatmul.msk.bf16.vlgmr.msrb.gmra.mxu2 %vm329_vm1, %v2071_v32  ;;  %2013 = vmatmul.msk.bf16.gmra.mxu3 %vm329_vm1, %v2073_v25 }
 0x18b   : > { %2005 = vmatmul.msk.bf16.vlgmr.msrb.gmra.mxu1 %vm329_vm1, %v2071_v32  ;;  %1464 = vmatpush.bf16.msra.mxu2 %v1407_v56  ;;  %v791_v52 = vadd.f32 %v2617_v11, %v2670_v58 }
 0x18d   : > { %v752_v60 = vpop.f32.mrf.mxu2 }
 0x18e   : > { %v2679_v63 = vadd.f32 %v752_v60, %v654_v22 }
 0x190   : > { %v637_v9 = vpop.f32.mrf.mxu0  ;;  %v730_v10 = vpop.f32.mrf.mxu1 }
 0x191   : > { %v655_v13 = vadd.f32 %v637_v9, %v2584_v3  ;;  %v2686_v14 = vadd.f32 %v730_v10, %v2611_v24  ;;  %v1003_v28 = vpop.f32.mrf.mxu3 }
 0x193   : > { %1984 = vmatmul.msk.bf16.vlgmr.msrb.gmra.mxu0 %vm329_vm1, %v2542_v38  ;;  %v794_v11 = vadd.f32 %v2636_v39, %v655_v13 }
 0x195   : > { %v754_v19 = vpop.f32.mrf.mxu2 }
 0x196   : > { %v796_v22 = vadd.f32 %v754_v19, %v2621_v31 }
 0x198   : > { %v639_v23 = vpop.f32.mrf.mxu0  ;;  %v733_v26 = vpop.f32.mrf.mxu1 }
 0x199   : > { %v658_v3 = vadd.f32 %v639_v23, %v2604_v20  ;;  %v2694_v24 = vadd.f32 %v733_v26, %v2629_v27  ;;  %v1006_v27 = vpop.f32.mrf.mxu3 }
 0x19a   : > { %2009 = vmatmul.msk.bf16.gmra.mxu2 %vm329_vm1, %v2072_v47 }
 0x19b   : > { %2006 = vmatmul.msk.bf16.gmra.mxu1 %vm329_vm1, %v2072_v47  ;;  %v797_v56 = vadd.f32 %v2649_v43, %v658_v3 }
 0x19d   : > { %v757_v29 = vpop.f32.mrf.mxu2 }
 0x19e   : > { %v799_v38 = vadd.f32 %v757_v29, %v2638_v42 }
 0x1a0   : > { %v642_v61 = vpop.f32.mrf.mxu0  ;;  %v735_v32 = vpop.f32.mrf.mxu1 }
 0x1a1   : > { %v661_v33 = vadd.f32 %v642_v61, %v2615_v30  ;;  %v2701_v31 = vadd.f32 %v735_v32, %v2643_v41  ;;  %v788_v41 = vadd.f32 %v2606_v21, %v649_v54  ;;  %v1008_v2 = vpop.f32.mrf.mxu3  ;;  %v2076_v32 = vld [vmem:[%s2919_s3 + $0xd0] sm:$0xff] }
 0x1a3   : > { %v2703_v35 = vadd.f32 %v781_v57, %v661_v33  ;;  %1985 = vmatmul.msk.bf16.gmra.mxu0 %vm329_vm1, %v2566_v51  ;;  %v2074_v57 = vld [vmem:[%s2919_s3 + $0xc0] sm:$0xff] }
 0x1a5   : > { %v759_v20 = vpop.f32.mrf.mxu2 }
 0x1a6   : > { %v2707_v36 = vadd.f32 %v759_v20, %v663_v50 }
 0x1a8   : > { %v644_v44 = vpop.f32.mrf.mxu0  ;;  %v886_v45 = vpop.f32.mrf.mxu1 }
 0x1a9   : > { %v664_v42 = vadd.f32 %v644_v44, %v2634_v37  ;;  %v2710_v46 = vadd.f32 %v886_v45, %v787_v53  ;;  %v1011_v1 = vpop.f32.mrf.mxu3 }
 0x1aa   : > { %2010 = vmatmul.msk.bf16.gmra.mxu2 %vm329_vm1, %v2073_v25 }
 0x1ab   : > { %v2713_v30 = vadd.f32 %v783_v6, %v664_v42  ;;  %2007 = vmatmul.msk.bf16.gmra.mxu1 %vm329_vm1, %v2073_v25 }
 0x1ad   : > { %v910_v49 = vpop.f32.mrf.mxu2 }
 0x1ae   : > { %v2717_v51 = vadd.f32 %v910_v49, %v788_v41 }
 0x1b0   : > { %v862_v50 = vpop.f32.mrf.mxu0  ;;  %v888_v47 = vpop.f32.mrf.mxu1 }
 0x1b1   : > { %v925_v40 = vadd.f32 %v862_v50, %v2647_v34  ;;  %v2721_v37 = vadd.f32 %v888_v47, %v2667_v62  ;;  %v1013_v39 = vpop.f32.mrf.mxu3 }
 0x1b3   : > { %v2723_v53 = vadd.f32 %v1001_v17, %v925_v40  ;;  %1986 = vmatmul.msk.bf16.gmra.mxu0 %vm329_vm1, %v2596_v4  ;;  %v279_v17 = vld [vmem:[%s2921_s5] sm:$0xff] }
 0x1b5   : > { %v912_v21 = vpop.f32.mrf.mxu2 }
 0x1b6   : > { %v2729_v54 = vadd.f32 %v912_v21, %v791_v52 }
 0x1b8   : > { %v864_v59 = vpop.f32.mrf.mxu0  ;;  %v891_v34 = vpop.f32.mrf.mxu1 }
 0x1b9   : > { %v928_v62 = vadd.f32 %v864_v59, %v2662_v55  ;;  %v2736_v0 = vadd.f32 %v891_v34, %v2679_v63  ;;  %v2226_v63 = vmov 0   ;;  %v1164_v19 = vpop.f32.mrf.mxu3 }
 0x1ba   : > { %2038 = vmatmul.msk.bf16.vlgmr.msra.gmra.mxu2 %vm329_vm1, %v2074_v57  ;;  %2133 = vset.pattern.permute.xlu1 %v2226_v63 }
 0x1bb   : > { %v2739_v4 = vadd.f32 %v1003_v28, %v928_v62  ;;  %2035 = vmatmul.msk.bf16.vlgmr.msra.gmra.mxu1 %vm329_vm1, %v2074_v57  ;;  %2132 = vset.pattern.permute.xlu0 %v2226_v63 }
 0x1bc   : > { %1501 = vperm.xlu1 %2133, %v277_v7   ;;  %2134 = vset.pattern.permute.xlu2 %v2226_v63 }
 0x1bd   : > { %v915_v58 = vpop.f32.mrf.mxu2 }
 0x1be   : > { %v2743_v6 = vadd.f32 %v915_v58, %v794_v11 }
 0x1c0   : > { %v867_v48 = vpop.f32.mrf.mxu0  ;;  %v893_v60 = vpop.f32.mrf.mxu1 }
 0x1c1   : > { %v931_v25 = vadd.f32 %v867_v48, %v2672_v5  ;;  %v2746_v55 = vadd.f32 %v893_v60, %v796_v22  ;;  %v2075_v5 = vld [vmem:[%s2919_s3 + $0xc8] sm:$0xff]  ;;  %v1166_v33 = vpop.f32.mrf.mxu3 }
 0x1c3   : > { %v1070_v8 = vadd.f32 %v1006_v27, %v931_v25  ;;  %2032 = vmatmul.msk.bf16.vlgmr.msra.gmra.mxu0 %vm329_vm1, %v2074_v57 }
 0x1c4   : > { %1517 = vperm.xlu1 %2133, %v279_v17  }
 0x1c5   : > { %v917_v9 = vpop.f32.mrf.mxu2 }
 0x1c6   : > { %v936_v10 = vadd.f32 %v917_v9, %v797_v56 }
 0x1c8   : > { %v869_v12 = vpop.f32.mrf.mxu0  ;;  %v896_v13 = vpop.f32.mrf.mxu1 }
 0x1c9   : > { %v934_v15 = vadd.f32 %v869_v12, %v2686_v14  ;;  %v2757_v16 = vadd.f32 %v896_v13, %v799_v38  ;;  %v278_v14 = vld [vmem:[%s2920_s4 + $0x8] sm:$0xff] }
 0x1ca   : > { %2039 = vmatmul.msk.bf16.gmra.mxu2 %vm329_vm1, %v2075_v5  ;;  %1506 = vperm.xlu0 %2132, %v278_v14  }
 0x1cb   : > { %v1073_v43 = vadd.f32 %v1008_v2, %v934_v15  ;;  %2036 = vmatmul.msk.bf16.gmra.mxu1 %vm329_vm1, %v2075_v5  ;;  %v1169_v2 = vpop.f32.mrf.mxu3 }
 0x1cd   : > { %v920_v18 = vpop.f32.mrf.mxu2 }
 0x1ce   : > { %v939_v22 = vadd.f32 %v920_v18, %v2703_v35 }
 0x1d0   : > { %v872_v23 = vpop.f32.mrf.mxu0  ;;  %v898_v26 = vpop.f32.mrf.mxu1 }
 0x1d1   : > { %v937_v3 = vadd.f32 %v872_v23, %v2694_v24  ;;  %v941_v28 = vadd.f32 %v898_v26, %v2707_v36 }
 0x1d3   : > { %v1076_v29 = vadd.f32 %v1011_v1, %v937_v3  ;;  %2033 = vmatmul.msk.bf16.gmra.mxu0 %vm329_vm1, %v2075_v5 }
 0x1d5   : > { %v922_v38 = vpop.f32.mrf.mxu2 }
 0x1d6   : > { %v942_v61 = vadd.f32 %v922_v38, %v2713_v30 }
 0x1d8   : > { %v874_v35 = vpop.f32.mrf.mxu0  ;;  %v1049_v20 = vpop.f32.mrf.mxu1 }
 0x1d9   : > { %v940_v27 = vadd.f32 %v874_v35, %v2701_v31  ;;  %v1066_v44 = vadd.f32 %v1049_v20, %v2717_v51 }
 0x1da   : > { %2040 = vmatmul.msk.bf16.gmra.mxu2 %vm329_vm1, %v2076_v32 }
 0x1db   : > { %v1079_v24 = vadd.f32 %v1013_v39, %v940_v27  ;;  %2037 = vmatmul.msk.bf16.gmra.mxu1 %vm329_vm1, %v2076_v32 }
 0x1dd   : > { %v1140_v36 = vpop.f32.mrf.mxu2 }
 0x1de   : > { %v1203_v45 = vadd.f32 %v1140_v36, %v2723_v53  ;;  %v280_v53 = vld [vmem:[%s2921_s5 + $0x8] sm:$0xff] }
 0x1df   : > { %1522 = vperm.xlu2 %2134, %v280_v53  }
 0x1e0   : > { %v1025_v42 = vpop.f32.mrf.mxu0  ;;  %v1051_v30 = vpop.f32.mrf.mxu1 }
 0x1e1   : > { %v1065_v41 = vadd.f32 %v1025_v42, %v2710_v46  ;;  %v1069_v49 = vadd.f32 %v1051_v30, %v2729_v54  ;;  %v1171_v54 = vpop.f32.mrf.mxu3 }
 0x1e3   : > { %v1204_v50 = vadd.f32 %v1164_v19, %v1065_v41  ;;  %2034 = vmatmul.msk.bf16.gmra.mxu0 %vm329_vm1, %v2076_v32  ;;  %vm1623_vm1 = vcmask 392192  }
 0x1e5   : > { %v1142_v31 = vpop.f32.mrf.mxu2 }
 0x1e6   : > { %v1206_v51 = vadd.f32 %v1142_v31, %v2739_v4 }
 0x1e8   : > { %v1027_v47 = vpop.f32.mrf.mxu0  ;;  %v1054_v40 = vpop.f32.mrf.mxu1 }
 0x1e9   : > { %v1068_v52 = vadd.f32 %v1027_v47, %v2721_v37  ;;  %v1072_v21 = vadd.f32 %v1054_v40, %v2743_v6  ;;  %v2790_v48 = vpop.f32.mrf.mxu3 }
 0x1eb   : > { %v1207_v46 = vadd.f32 %v1166_v33, %v1068_v52 }
 0x1ed   : > { %v1145_v57 = vpop.f32.mrf.mxu2 }
 0x1ee   : > { %v1209_v59 = vadd.f32 %v1145_v57, %v1070_v8 }
 0x1f0   : > { %v1030_v34 = vpop.f32.mrf.mxu0  ;;  %v1056_v62 = vpop.f32.mrf.mxu1 }
 0x1f1   : > { %v1071_v1 = vadd.f32 %v1030_v34, %v2736_v0  ;;  %v1075_v4 = vadd.f32 %v1056_v62, %v936_v10  ;;  %v2797_v8 = vpop.f32.mrf.mxu3 }
 0x1f3   : > { %v1210_v11 = vadd.f32 %v1169_v2, %v1071_v1 }
 0x1f5   : > { %v1147_v58 = vpop.f32.mrf.mxu2 }
 0x1f6   : > { %v1212_v37 = vadd.f32 %v1147_v58, %v1073_v43 }
 0x1f8   : > { %v1032_v6 = vpop.f32.mrf.mxu0  ;;  %v1059_v60 = vpop.f32.mrf.mxu1 }
 0x1f9   : > { %v1074_v25 = vadd.f32 %v1032_v6, %v2746_v55  ;;  %v2793_v63 = vadd.f32 %v1059_v60, %v939_v22  ;;  %v1327_v18 = vpop.f32.mrf.mxu3 }
 0x1fb   : > { %v1213_v7 = vadd.f32 %v1171_v54, %v1074_v25 }
 0x1fd   : > { %v1150_v39 = vpop.f32.mrf.mxu2 }
 0x1fe   : > { %v2795_v56 = vadd.f32 %v1150_v39, %v1076_v29 }
 0x200   : > { %v1035_v9 = vpop.f32.mrf.mxu0  ;;  %v1061_v0 = vpop.f32.mrf.mxu1 }
 0x201   : > { %v2800_v10 = vadd.f32 %v1035_v9, %v2757_v16  ;;  %v2802_v5 = vadd.f32 %v1061_v0, %v942_v61  ;;  %v1329_v16 = vpop.f32.mrf.mxu3 }
 0x205   : > { %v1152_v12 = vpop.f32.mrf.mxu2 }
 0x206   : > { %v2804_v13 = vadd.f32 %v1152_v12, %v1079_v24 }
 0x208   : > { %v1037_v15 = vpop.f32.mrf.mxu0  ;;  %v1279_v55 = vpop.f32.mrf.mxu1 }
 0x209   : > { %v2806_v17 = vadd.f32 %v1037_v15, %v941_v28  ;;  %v1342_v43 = vadd.f32 %v1279_v55, %v1203_v45  ;;  %v1332_v28 = vpop.f32.mrf.mxu3 }
 0x20d   : > { %v1303_v19 = vpop.f32.mrf.mxu2 }
 0x20e   : > { %v1343_v22 = vadd.f32 %v1303_v19, %v1204_v50  ;;  %v1216_v19 = vadd.f32 %v2790_v48, %v2800_v10  ;;  %v1219_v48 = vadd.f32 %v2797_v8, %v2806_v17  ;;  %v283_v10 = vld [vmem:[%s275_s24] sm:$0x7] }
 0x20f   : > { %v2041_v17 = vadd.f32 -1.0, %v283_v10 }
 0x210   : > { %v1188_v14 = vpop.f32.mrf.mxu0  ;;  %v1281_v23 = vpop.f32.mrf.mxu1 }
 0x211   : > { %v1205_v26 = vadd.f32 %v1188_v14, %v1066_v44  ;;  %v1345_v3 = vadd.f32 %v1281_v23, %v1206_v51  ;;  %v1334_v31 = vpop.f32.mrf.mxu3 }
 0x213   : > { %v1344_v29 = vadd.f32 %v1327_v18, %v1205_v26 }
 0x215   : > { %v1305_v38 = vpop.f32.mrf.mxu2 }
 0x216   : > { %v1346_v61 = vadd.f32 %v1305_v38, %v1207_v46 }
 0x218   : > { %v1190_v32 = vpop.f32.mrf.mxu0  ;;  %v1284_v33 = vpop.f32.mrf.mxu1 }
 0x219   : > { %v1208_v35 = vadd.f32 %v1190_v32, %v1069_v49  ;;  %v1348_v20 = vadd.f32 %v1284_v33, %v1209_v59  ;;  %v1337_v26 = vpop.f32.mrf.mxu3 }
 0x21b   : > { %v1347_v27 = vadd.f32 %v1329_v16, %v1208_v35 }
 0x21d   : > { %v1308_v24 = vpop.f32.mrf.mxu2 }
 0x21e   : > { %v1349_v36 = vadd.f32 %v1308_v24, %v1210_v11 }
 0x220   : > { %v1193_v45 = vpop.f32.mrf.mxu0  ;;  %v1286_v42 = vpop.f32.mrf.mxu1 }
 0x221   : > { %v1211_v30 = vadd.f32 %v1193_v45, %v1072_v21  ;;  %v1351_v41 = vadd.f32 %v1286_v42, %v1212_v37 }
 0x223   : > { %v1350_v2 = vadd.f32 %v1332_v28, %v1211_v30 }
 0x225   : > { %v1310_v50 = vpop.f32.mrf.mxu2 }
 0x226   : > { %v1352_v44 = vadd.f32 %v1310_v50, %v1213_v7  ;;  %v1339_v50 = vpop.f32.mrf.mxu3 }
 0x228   : > { %v1195_v51 = vpop.f32.mrf.mxu0  ;;  %v1289_v47 = vpop.f32.mrf.mxu1 }
 0x229   : > { %v1214_v40 = vadd.f32 %v1195_v51, %v1075_v4 }
 0x22b   : > { %v1353_v52 = vadd.f32 %v1334_v31, %v1214_v40 }
 0x22d   : > { %v1313_v53 = vpop.f32.mrf.mxu2 }
 0x22e   : > { %v1502_v18 = vpop.permute.xlu1 %1501  ;;  %v1355_v23 = vadd.f32 %v1313_v53, %v1216_v19 }
 0x230   : > { %v1198_v46 = vpop.f32.mrf.mxu0  ;;  %v2808_v49 = vpop.f32.mrf.mxu1 }
 0x235   : > { %v1315_v54 = vpop.f32.mrf.mxu2 }
 0x236   : > { %v1518_v35 = vpop.permute.xlu1 %1517  ;;  %v1358_v24 = vadd.f32 %v1315_v54, %v1219_v48 }
 0x238   : > { %v1200_v57 = vpop.f32.mrf.mxu0  ;;  %v1442_v59 = vpop.f32.mrf.mxu1 }
 0x239   : > { %v2810_v34 = vadd.f32 %v1442_v59, %v1343_v22  ;;  %v1220_v28 = vadd.f32 %v1200_v57, %v2802_v5  ;;  %v1523_v59 = vpop.permute.xlu2 %1522 }
 0x23b   : > { %v1359_v53 = vadd.f32 %v1339_v50, %v1220_v28 }
 0x23c   : > { %v1507_v8 = vpop.permute.xlu0 %1506 }
 0x23d   : > { %v1466_v62 = vpop.f32.mrf.mxu2 }
 0x23e   : > { %v2812_v21 = vadd.f32 %v1466_v62, %v1344_v29 }
 0x240   : > { %v1418_v1 = vpop.f32.mrf.mxu0  ;;  %v1444_v11 = vpop.f32.mrf.mxu1 }
 0x241   : > { %v2814_v58 = vadd.f32 %v1418_v1, %v1342_v43  ;;  %v2816_v37 = vadd.f32 %v1444_v11, %v1346_v61  ;;  %v1357_v11 = vadd.f32 %v2808_v49, %v2804_v13 }
 0x245   : > { %v1468_v4 = vpop.f32.mrf.mxu2 }
 0x246   : > { %v2818_v6 = vadd.f32 %v1468_v4, %v1347_v27 }
 0x248   : > { %v1420_v60 = vpop.f32.mrf.mxu0  ;;  %v1447_v25 = vpop.f32.mrf.mxu1 }
 0x249   : > { %v2820_v7 = vadd.f32 %v1420_v60, %v1345_v3  ;;  %v2822_v39 = vadd.f32 %v1447_v25, %v1349_v36  ;;  %v1217_v3 = vadd.f32 %v1198_v46, %v2793_v63  ;;  %v1354_v63 = vadd.f32 %v1289_v47, %v2795_v56 }
 0x24a   : > { %v1533_v36 = vperm.slane %v283_v10, 1  ;;  %v1565_v47 = vperm.slane %v2041_v17, 2  ;;  %v1563_v60 = vperm.slane %v2041_v17, 0 }
 0x24b   : > { %v1356_v32 = vadd.f32 %v1337_v26, %v1217_v3 }
 0x24d   : > { %v1471_v9 = vpop.f32.mrf.mxu2 }
 0x24e   : > { %v2824_v0 = vadd.f32 %v1471_v9, %v1350_v2  ;;  %v1534_v2 = vperm.slane %v283_v10, 2 }
 0x250   : > { %v1423_v12 = vpop.f32.mrf.mxu0  ;;  %v1449_v15 = vpop.f32.mrf.mxu1 }
 0x251   : > { %v2826_v55 = vadd.f32 %v1423_v12, %v1348_v20  ;;  %v2828_v43 = vadd.f32 %v1449_v15, %v1352_v44  ;;  %v1564_v15 = vperm.slane %v2041_v17, 1 }
 0x255   : > { %v1473_v22 = vpop.f32.mrf.mxu2 }
 0x256   : > { %v2832_v14 = vadd.f32 %v1473_v22, %v1353_v52  ;;  %v1532_v52 = vperm.slane %v283_v10, 0 }
 0x258   : > { %v1425_v29 = vpop.f32.mrf.mxu0  ;;  %v1452_v16 = vpop.f32.mrf.mxu1 }
 0x259   : > { %v2836_v38 = vadd.f32 %v1425_v29, %v1351_v41  ;;  %v1494_v61 = vadd.f32 %v1452_v16, %v1355_v23 }
 0x25b   : > { %v1510_v33 = vmul.f32 %v1502_v18, %v1494_v61 }
 0x25d   : > { %v1476_v20 = vpop.f32.mrf.mxu2  ;;  %v1526_v45 = vadd.f32 %v1518_v35, %v1510_v33 }
 0x25e   : > { %v1495_v27 = vadd.f32 %v1476_v20, %v1356_v32 }
 0x25f   : > { %v1539_v46 = vmul.f32 %v1533_v36, %v1526_v45 }
 0x260   : > { %v1511_v42 = vmul.f32 %v1502_v18, %v1495_v27  ;;  %v1428_v30 = vpop.f32.mrf.mxu0  ;;  %v1454_v41 = vpop.f32.mrf.mxu1 }
 0x261   : > { %v1493_v44 = vadd.f32 %v1428_v30, %v1354_v63  ;;  %v1497_v31 = vadd.f32 %v1454_v41, %v1358_v24  ;;  %v1545_v12 = vmax.f32 %v1539_v46, 0.0 }
 0x262   : > { %v1527_v51 = vadd.f32 %v1518_v35, %v1511_v42 }
 0x263   : > { %v1509_v40 = vmul.f32 %v1502_v18, %v1493_v44  ;;  %v1513_v5 = vmul.f32 %v1507_v8, %v1497_v31  ;;  %v1570_v33 = vadd.f32 %v1564_v15, %v1545_v12 }
 0x264   : > { %v1540_v56 = vmul.f32 %v1534_v2, %v1527_v51  ;;  %v1586_v51 = vstv %s1585_s16  ;;  %s1721_s16 = scalar_lea.hbm %s2923_s7, %s2080_s22 }
 0x265   : > { %v1525_v54 = vadd.f32 %v1518_v35, %v1509_v40  ;;  %v1478_v57 = vpop.f32.mrf.mxu2  ;;  %v1529_v19 = vadd.f32 %v1523_v59, %v1513_v5  ;;  %2135 = vrsqrt.f32 %v1586_v51  ;;  %vm1610_vm11 = vcmp.eq.f32.partialorder %v1586_v51, inf  ;;  %s1724_s26 = sshll.u32 %s1721_s16, 4  ;;  %s1725_s26 = int_to_ptr.hbm [resolvable:$true] %s1724_s26 }
 0x266   : > { %v1498_v62 = vadd.f32 %v1478_v57, %v1359_v53  ;;  %v1546_v1 = vmax.f32 %v1540_v56, 0.0  ;;  %2137 = vrcp.f32 %v1586_v51  ;;  %vm1592_vm12 = vweird.f32 %v1586_v51  ;;  %s2165_s27 = sshra.s32 %s1725_s26, 4  ;;  %s2166_s27 = int_to_ptr.hbm [resolvable:$true] %s2165_s27 }
 0x267   : > { %v1538_v4 = vmul.f32 %v1532_v52, %v1525_v54  ;;  %v1542_v49 = vmul.f32 %v1533_v36, %v1529_v19  ;;  %vm1612_vm14 = vcmp.eq.f32.partialorder %v1586_v51, 0.0  ;;  %s2167_s9 = scalar_lea.hbm %s2166_s27, 96  ;;  %p2172_p0 = scmp.lt.s32.totalorder %s2166_s27, %s2923_s7 }
 0x268   : > { %v1514_v25 = vmul.f32 %v1507_v8, %v1498_v62  ;;  %v1430_v9 = vpop.f32.mrf.mxu0  ;;  %v1571_v18 = vadd.f32 %v1565_v47, %v1546_v1  ;;  %v1552_v61 = vsel %vm1551_vm10, %v1546_v1, 0.0  ;;  %v1596_v1 = vand.u32 2147483647, %v1586_v51  ;;  %p2168_p11 = scmp.ne.s32.totalorder %s2166_s27, %s2167_s9  ;;  %p2173_p1 = scmp.lt.s32.totalorder %s2171_s17, %s2167_s9 }
 0x269   : > { %v1496_v22 = vadd.f32 %v1430_v9, %v1357_v11  ;;  %v1544_v23 = vmax.f32 %v1538_v4, 0.0  ;;  %v1548_v45 = vmax.f32 %v1542_v49, 0.0 }
 0x26a   : > { %v1530_v26 = vadd.f32 %v1523_v59, %v1514_v25  ;;  %v1575_v13 = vsel %vm1551_vm10, %v1571_v18, -inf  ;;  %vm1597_vm0 = vcmp.eq.f32.partialorder %v1596_v1, 8.507059e+37  ;;  %p2169_p12 = pnand %p2168_p11, %p2310_p5  ;;  %p2174_p2 = por %p2173_p1, %p2172_p0 }
 0x26b   : > { %v1512_v3 = vmul.f32 %v1507_v8, %v1496_v22  ;;  %v1550_v29 = vadd.f32 %v1545_v12, %v1544_v23  ;;  %v1569_v16 = vadd.f32 %v1563_v60, %v1544_v23  ;;  %v1573_v44 = vadd.f32 %v1564_v15, %v1548_v45  ;;  %v2136_v8 = vpop.eup %2135 }
 0x26c   : > { %v1543_v32 = vmul.f32 %v1534_v2, %v1530_v26  ;;  %v1604_v17 = vmul.f32 %v2136_v8, %v1586_v51  ;;  %v2138_v53 = vpop.eup %2137  ;;  %p2170_p13 = pneg %p2169_p12 }
 0x26d   : > { %v1528_v48 = vadd.f32 %v1523_v59, %v1512_v3  ;;  %v1553_v10 = vadd.f32 %v1552_v61, %v1550_v29  ;;  %v1576_v35 = vmax.f32 %v1569_v16, %v1575_v13  ;;  %v1588_v46 = vmul.f32 %v2138_v53, %v1586_v51  ;;  %v1619_v61 = vld [vmem:[%s2922_s6] sm:$0xff]  ;;  %v1622_v13 = vld [vmem:[%s2922_s6 + $0x18] sm:$0xff] }
 0x26e   : > { %v1549_v20 = vmax.f32 %v1543_v32, 0.0  ;;  %v1605_v40 = vmul.f32 %v2136_v8, %v1604_v17  ;;  %vm1593_vm13 = vweird.f32 %v2138_v53  ;;  %v1598_v59 = vand.u32 2147483648, %v1586_v51  ;;  %v1620_v32 = vld [vmem:[%s2922_s6 + $0x8] sm:$0xff]  ;;  %p2175_p3 = pnand %p2174_p2, %p2170_p13 }
 0x26f   : > { %1554 = vadd.xlane.f32.xlu1 %v1553_v10  ;;  %v1541_v27 = vmul.f32 %v1532_v52, %v1528_v48  ;;  %v1577_v63 = vmax.f32 %v1576_v35, %v1570_v33  ;;  %vm1594_vm15 = vmor %vm1592_vm12, %vm1593_vm13  ;;  %v1621_v33 = vld [vmem:[%s2922_s6 + $0x10] sm:$0xff] }
 0x270   : > { %v1574_v24 = vadd.f32 %v1565_v47, %v1549_v20  ;;  %v1557_v41 = vsel %vm1551_vm10, %v1549_v20, 0.0  ;;  %v1606_v52 = vmul.f32 0.5, %v1605_v40  ;;  %v1589_v47 = vsub.f32 1.0, %v1588_v46 }
 0x271   : > { %v1547_v28 = vmax.f32 %v1541_v27, 0.0  ;;  %v1599_v4 = vor.u32 1.1754944e-38, %v1598_v59 }
 0x272   : > { %v1580_v2 = vsel %vm1551_vm10, %v1574_v24, -inf  ;;  %v1607_v56 = vsub.f32 1.5, %v1606_v52  ;;  %v1590_v5 = vmul.f32 %v2138_v53, %v1589_v47 }
 0x273   : > { %v1556_v42 = vadd.f32 %v1548_v45, %v1547_v28  ;;  %v1572_v30 = vadd.f32 %v1563_v60, %v1547_v28 }
 0x274   : > { %v1608_v54 = vmul.f32 %v2136_v8, %v1607_v56  ;;  %v1591_v62 = vadd.f32 %v2138_v53, %v1590_v5 }
 0x275   : > { %v1558_v50 = vadd.f32 %v1557_v41, %v1556_v42  ;;  %v1581_v36 = vmax.f32 %v1572_v30, %v1580_v2 }
 0x276   : > { %v1609_v57 = vmul.f32 %v1608_v54, %v1586_v51  ;;  %v1595_v9 = vsel %vm1594_vm15, %v2138_v53, %v1591_v62 }
 0x277   : > { %1559 = vadd.xlane.f32.xlu2 %v1558_v50  ;;  %v1582_v31 = vmax.f32 %v1581_v36, %v1573_v44  ;;  %v1600_v18 = vsel %vm1597_vm0, %v1599_v4, %v1595_v9 }
 0x278   : > { %v1611_v11 = vsel %vm1610_vm11, %v1586_v51, %v1609_v57 }
 0x279   : > { %1583 = vmax.xlane.f32.xlu0 %v1582_v31  ;;  %v1614_v60 = vsel %vm1612_vm14, %v1598_v59, %v1611_v11 }
 0x27a   : > { %v2042_v15 = vadd.f32 -14.0, %v1614_v60 }
 0x27c   : > { %v1616_v23 = vmul.f32 0.1, %v2042_v15 }
 0x27f   : > { %1578 = vmax.xlane.f32.xlu2 %v1577_v63 }
 0x2e2   : > { %v1555_v19 = vpop.xlane.xlu1 %1554 }
 0x2e3   : > { %v1601_v26 = vmul.f32 %v1600_v18, %v1555_v19 }
 0x2e5   : > { %v1617_v16 = vmul.f32 %v1616_v23, %v1601_v26 }
 0x2ea   : > { %v1560_v25 = vpop.xlane.xlu2 %1559 }
 0x2eb   : > { %v1602_v22 = vmul.f32 %v1600_v18, %v1560_v25 }
 0x2ec   : > { %v1584_v12 = vpop.xlane.xlu0 %1583 }
 0x2ed   : > { %1646 = vmatpush.msra.mxu3 %v1584_v12  ;;  %v1618_v29 = vmul.f32 %v1616_v23, %v1602_v22 }
 0x2f2   : > { %v1579_v3 = vpop.xlane.xlu2 %1578 }
 0x2f3   : > { %1647 = vmatpush.msra.mxu3 %v1579_v3 }
 0x2f5   : > { %1648 = vmatpush.msra.mxu3 %v1618_v29 }
 0x2f7   : > { %1649 = vmatpush.msra.mxu3 %v1617_v16 }
 0x2f9   : > { %1650 = vmatpush.msra.mxu3 %v1602_v22 }
 0x2fb   : > { %1651 = vmatpush.msra.mxu3 %v1601_v26 }
 0x2fc   : > { %2043 = vmatmul.msk.f32.vlgmr.msra.gmra.mxu3 %vm1623_vm1, %v1619_v61 }
 0x304   : > { %2044 = vmatmul.msk.f32.gmra.mxu3 %vm1623_vm1, %v1620_v32 }
 0x30c   : > { %2045 = vmatmul.msk.f32.gmra.mxu3 %vm1623_vm1, %v1621_v33 }
 0x314   : > { %2046 = vmatmul.msk.f32.gmra.mxu3 %vm1623_vm1, %v1622_v13 }
 0x37f   : > { %v1653_v49 = vpop.f32.mrf.mxu3 }
 0x380   : > { %1667 = vperm.xlu2 %2134, %v1653_v49  }
 0x387   : > { %v1656_v48 = vpop.f32.mrf.mxu3 }
 0x388   : > { %1672 = vperm.xlu0 %2132, %v1656_v48  }
 0x38f   : > { %v1659_v10 = vpop.f32.mrf.mxu3 }
 0x390   : > { %1677 = vperm.xlu1 %2133, %v1659_v10  }
 0x397   : > { %v1662_v35 = vpop.f32.mrf.mxu3 }
 0x398   : > { %1682 = vperm.xlu0 %2132, %v1662_v35  }
 0x3da   : > { %v1668_v20 = vpop.permute.xlu2 %1667 }
 0x3db   : > { %v1685_v27 = vadd.f32 %v1668_v20, %v2814_v58  ;;  %v1686_v63 = vadd.f32 %v1668_v20, %v2810_v34  ;;  %v1687_v24 = vadd.f32 %v1668_v20, %v2812_v21 }
 0x3dd   : > { %1697 = vst [vmem:[%s266_s21] sm:$0xff] %v1685_v27 }
 0x3de   : > { %1698 = vst [vmem:[%s266_s21 + $0x8] sm:$0xff] %v1686_v63 }
 0x3df   : > { %1699 = vst.msk [vmem:[%s266_s21 + $0x10] sm:$0xff] %vm1551_vm10, %v1687_v24 }
 0x3fa   : > { %v1673_v28 = vpop.permute.xlu0 %1672 }
 0x3fb   : > { %v1688_v45 = vadd.f32 %v1673_v28, %v2820_v7  ;;  %v1689_v42 = vadd.f32 %v1673_v28, %v2816_v37  ;;  %v1690_v30 = vadd.f32 %v1673_v28, %v2818_v6 }
 0x3fd   : > { %1700 = vst [vmem:[%s266_s21 + $0x18] sm:$0xff] %v1688_v45 }
 0x3fe   : > { %1701 = vst [vmem:[%s266_s21 + $0x20] sm:$0xff] %v1689_v42 }
 0x3ff   : > { %1702 = vst.msk [vmem:[%s266_s21 + $0x28] sm:$0xff] %vm1551_vm10, %v1690_v30 }
 0x402   : > { %v1678_v58 = vpop.permute.xlu1 %1677 }
 0x403   : > { %v1691_v34 = vadd.f32 %v1678_v58, %v2826_v55  ;;  %v1692_v21 = vadd.f32 %v1678_v58, %v2822_v39  ;;  %v1693_v41 = vadd.f32 %v1678_v58, %v2824_v0 }
 0x405   : > { %1703 = vst [vmem:[%s266_s21 + $0x30] sm:$0xff] %v1691_v34 }
 0x406   : > { %1704 = vst [vmem:[%s266_s21 + $0x38] sm:$0xff] %v1692_v21 }
 0x407   : > { %1705 = vst.msk [vmem:[%s266_s21 + $0x40] sm:$0xff] %vm1551_vm10, %v1693_v41 }
 0x40a   : > { %v1683_v37 = vpop.permute.xlu0 %1682 }
 0x40b   : > { %v1694_v6 = vadd.f32 %v1683_v37, %v2836_v38  ;;  %v1695_v7 = vadd.f32 %v1683_v37, %v2828_v43  ;;  %v1696_v39 = vadd.f32 %v1683_v37, %v2832_v14 }
 0x40d   : > { %1706 = vst [vmem:[%s266_s21 + $0x48] sm:$0xff] %v1694_v6 }
 0x40e   : > { %1707 = vst [vmem:[%s266_s21 + $0x50] sm:$0xff] %v1695_v7 }
 0x40f   : > { %1708 = vst.msk [vmem:[%s266_s21 + $0x58] sm:$0xff] %vm1551_vm10, %v1696_v39 }
 0x410   : > { %2178 = shalt.err (!%p2175_p3)
}
 0x411   : > { %s2227_s19 = smov 384   ;;  %s2228_s21 = smov 24  }
 0x412   : > { %2081 = dma.vmem_to_hbm [thread:$0]  (%p2310_p5), %s1723_s25, 1536, %s1725_s26, %s1710_s0, %s2227_s19, %s2227_s19, %s2228_s21  }
 0x413 PF: > { %p2087_p4 = scmp.ge.s32.totalorder %s2215_s8, 2  ;;  %s1739_s22 = sand.u32 1, %s2203_s28  }
 0x414   : > { %s1740_s23 = scalar_lea.sflag [#allocation5], %s1739_s22 }
 0x415   : > { %p2084_p7 = pnand %p2087_p4, %p2314_p6 }
 0x417   : > { %p2085_p8 = pneg %p2084_p7 }
 0x419   : > { %2198 = dma.done.wait (%p2085_p8), %s1740_s23, 1536  }
 0x41a   : > { %2200 = vsyncadd (%p2085_p8), %s1740_s23, 4294965760  ;;  %p25_p9 = scmp.ge.s32.totalorder %s2297_s10, 4   ;;  %s2926_s28 = smov %s2207_s29 }
 0x41b   : > { %s2927_s29 = smov %s2211_s30  ;;  %s2928_s30 = smov %s2308_s13 }
 0x41c   : > { %s2929_s8 = smov %s2297_s10  ;;  %27 = sbr.rel (!%p25_p9) target bundleno = 9 (0x9), region = 90 }
 0x421   :  { %1746 = vsyncpa [#allocation5], 1 }
 0x422   :  { %1748 = vsyncpa [#allocation5 + $0x1], 1 }

</bundles_post_ra>
